<compile_context>
chip_gen: v5e
topology: v5e:2x2
jax: 0.10.0
libtpu: 0.0.40
codegen_flags: <defaults>
</compile_context>

<pallas_src>
import functools

import jax
import jax.numpy as jnp
from jax.experimental import pallas as pl
from jax.experimental.pallas import tpu as pltpu

MAX_LENGTH = 10
SOS_token = 0


def _decode_kernel(dec_emb_ref, keys_ref, uk_ref, h0_ref,
                   wa_t_ref, va_ref,
                   wie_t_ref, wic_t_ref, b_ih_ref,
                   whh_t_ref, b_hh_ref,
                   wout_t_ref, b_out_ref, emb_ref,
                   logp_ref, attn_ref, hid_ref,
                   h_scr, emb_scr,
                   *, hidden_size, vocab_size, greedy, approx_recip):
    H, V = hidden_size, vocab_size
    t = pl.program_id(1)          # decode step (inner, "arbitrary" grid axis)

    # First decode step of this batch tile: load the carried state.
    @pl.when(t == 0)
    def _():
        h_scr[...] = h0_ref[...]
        if greedy:
            emb_scr[...] = dec_emb_ref[0]          # embedded SOS token

    h_prev = h_scr[...]                                            # (bt, H)
    embedded = emb_scr[...] if greedy else dec_emb_ref[0]          # (bt, H)

    # ---- Bahdanau attention.  Ua(keys) + (ba+bu) was precomputed on the host
    # (loop invariant); the Va bias is dropped (softmax shift invariance). ----
    wq = jnp.dot(h_prev, wa_t_ref[...],
                 preferred_element_type=jnp.float32)               # (bt, H)
    e = jnp.tanh(wq[:, None, :] + uk_ref[...])                     # (bt, S, H)
    scores = jnp.sum(e * va_ref[...][None, :, :], axis=-1)         # (bt, S)
    smax = jnp.max(scores, axis=-1, keepdims=True)
    p = jnp.exp(scores - smax)
    inv = pl.reciprocal(jnp.sum(p, axis=-1, keepdims=True), approx=approx_recip)
    attn = p * inv                                                 # (bt, S)
    # context: VPU multiply + sublane reduce (no M=1 batched matmul).
    ctx = jnp.sum(attn[:, :, None] * keys_ref[...], axis=1)        # (bt, H)

    # ---- GRU cell, PyTorch gate order (r, z, n).  W_ih pre-split on the host
    # so no in-kernel concat of [embedded | context] is needed. ----
    gx = (jnp.dot(embedded, wie_t_ref[...], preferred_element_type=jnp.float32)
          + jnp.dot(ctx, wic_t_ref[...], preferred_element_type=jnp.float32)
          + b_ih_ref[...])                                         # (bt, 3H)
    gh = jnp.dot(h_prev, whh_t_ref[...],
                 preferred_element_type=jnp.float32) + b_hh_ref[...]
    r = jax.nn.sigmoid(gx[:, :H] + gh[:, :H])
    z = jax.nn.sigmoid(gx[:, H:2 * H] + gh[:, H:2 * H])
    n = jnp.tanh(gx[:, 2 * H:] + r * gh[:, 2 * H:])
    h_new = (1.0 - z) * n + z * h_prev                             # (bt, H)

    # ---- Output projection + log-softmax over the vocabulary. ----
    logits = jnp.dot(h_new, wout_t_ref[...],
                     preferred_element_type=jnp.float32) + b_out_ref[...]
    lmax = jnp.max(logits, axis=-1, keepdims=True)
    shifted = logits - lmax
    lse = jnp.log(jnp.sum(jnp.exp(shifted), axis=-1, keepdims=True))
    logp = shifted - lse                                           # (bt, V)

    if greedy:
        # Greedy next token: first index attaining the row max (matches
        # torch.topk tie-breaking), then one-hot @ embedding table (MXU).
        lane = jax.lax.broadcasted_iota(jnp.int32, logits.shape, 1)
        first_max = jnp.min(jnp.where(logits == lmax, lane, V),
                            axis=-1, keepdims=True)
        onehot = (lane == first_max).astype(jnp.float32)           # (bt, V)
        emb_scr[...] = jnp.dot(onehot, emb_ref[...],
                               preferred_element_type=jnp.float32)

    h_scr[...] = h_new
    logp_ref[0] = logp.astype(logp_ref.dtype)
    attn_ref[0] = attn.astype(attn_ref.dtype)
    hid_ref[...] = h_new.astype(hid_ref.dtype)


def _pick_block_b(B, S, H, *, num_batch_tiles=None,
                  vmem_budget_bytes=16 * 1024 * 1024):
    """Largest batch tile (fewest grid steps; per-step overhead dominates at
    these shapes) whose double-buffered keys + Ua(keys) slabs fit the budget.
    Pass num_batch_tiles=2 on v7x so the "parallel" batch axis can shard
    across both TensorCores."""
    if num_batch_tiles is not None:
        assert B % num_batch_tiles == 0
        return B // num_batch_tiles
    cands = [d for d in range(B, 0, -1)
             if B % d == 0 and (d % 8 == 0 or d == B)]
    for d in cands:
        streamed = 2 * (2 * d * S * H * 4)       # keys + uk, double-buffered
        if streamed <= vmem_budget_bytes:
            return d
    return cands[-1]


def attn_decoder_forward(params, encoder_outputs, encoder_hidden,
                         target_tensor=None, *, num_batch_tiles=None,
                         approx_recip=True):
    """Pallas-fused AttnDecoderRNN.forward (greedy decode when target_tensor
    is None, teacher forcing otherwise).

    Returns (decoder_outputs (B, T, V) log-probs, decoder_hidden (1, B, H),
    attentions (T*B, S)) matching the PyTorch module."""
    keys = encoder_outputs
    B, S, H = keys.shape
    V = params["out_w"].shape[0]
    T = MAX_LENGTH
    greedy = target_tensor is None
    hp = jax.lax.Precision.HIGHEST

    block_b = _pick_block_b(B, S, H, num_batch_tiles=num_batch_tiles)
    assert B % block_b == 0
    nb = B // block_b

    # ---- Loop-invariant host-side precompute (runs ONCE, not per step). ----
    uk = jnp.einsum("bsh,oh->bso", keys, params["ua_w"], precision=hp)
    uk = uk + (params["ua_b"] + params["wa_b"])     # both biases live in tanh
    wa_t = params["wa_w"].T                          # (H, H)
    va = params["va_w"].reshape(1, H)                # Va bias dropped (no-op)

    w_ih_t = params["gru_w_ih"].T                    # (2H, 3H)
    wie_t, wic_t = w_ih_t[:H, :], w_ih_t[H:, :]      # embedded / context halves
    b_ih = params["gru_b_ih"].reshape(1, 3 * H)
    whh_t = params["gru_w_hh"].T                     # (H, 3H)
    b_hh = params["gru_b_hh"].reshape(1, 3 * H)
    wout_t = params["out_w"].T                       # (H, V)
    b_out = params["out_b"].reshape(1, V)
    emb = params["emb"]                              # (V, H)

    # Embedded decoder inputs.
    # TODO(synk): dropout on the embedding is eval-mode identity here.
    if greedy:
        dec_emb = jnp.zeros((T, B, H), jnp.float32)
        dec_emb = dec_emb.at[0].set(jnp.broadcast_to(emb[SOS_token], (B, H)))
    else:
        toks = jnp.concatenate(
            [jnp.full((B, 1), SOS_token, dtype=target_tensor.dtype),
             target_tensor[:, :T - 1]], axis=1)      # input token for each step
        dec_emb = jnp.transpose(emb[toks], (1, 0, 2))  # (T, B, H)

    h0 = encoder_hidden.reshape(B, H)

    const = lambda shape: pl.BlockSpec(shape, lambda b, t: (0,) * len(shape))

    kernel = functools.partial(_decode_kernel, hidden_size=H, vocab_size=V,
                               greedy=greedy, approx_recip=approx_recip)

    logp, attn, hid = pl.pallas_call(
        kernel,
        out_shape=(
            jax.ShapeDtypeStruct((T, B, V), jnp.float32),
            jax.ShapeDtypeStruct((T, B, S), jnp.float32),
            jax.ShapeDtypeStruct((B, H), jnp.float32),
        ),
        grid_spec=pltpu.PrefetchScalarGridSpec(
            num_scalar_prefetch=0,
            grid=(nb, T),                    # (batch tiles, decode steps)
            in_specs=[
                pl.BlockSpec((1, block_b, H), lambda b, t: (t, b, 0)),  # dec_emb
                pl.BlockSpec((block_b, S, H), lambda b, t: (b, 0, 0)),  # keys
                pl.BlockSpec((block_b, S, H), lambda b, t: (b, 0, 0)),  # Ua(keys)+bias
                pl.BlockSpec((block_b, H), lambda b, t: (b, 0)),        # initial hidden
                const((H, H)),          # Wa^T
                const((1, H)),          # Va row
                const((H, 3 * H)),      # W_ih^T (embedded half)
                const((H, 3 * H)),      # W_ih^T (context half)
                const((1, 3 * H)),      # b_ih
                const((H, 3 * H)),      # W_hh^T
                const((1, 3 * H)),      # b_hh
                const((H, V)),          # W_out^T
                const((1, V)),          # b_out
                const((V, H)),          # embedding table (greedy lookup)
            ],
            out_specs=[
                pl.BlockSpec((1, block_b, V), lambda b, t: (t, b, 0)),  # log-probs
                pl.BlockSpec((1, block_b, S), lambda b, t: (t, b, 0)),  # attn weights
                pl.BlockSpec((block_b, H), lambda b, t: (b, 0)),        # final hidden
            ],
            scratch_shapes=[
                pltpu.VMEM((block_b, H), jnp.float32),   # hidden-state carry
                pltpu.VMEM((block_b, H), jnp.float32),   # next-token embedding carry
            ],
        ),
        compiler_params=pltpu.CompilerParams(
            dimension_semantics=("parallel", "arbitrary"),
            vmem_limit_bytes=32 * 1024 * 1024,
        ),
    )(dec_emb, keys, uk, h0, wa_t, va, wie_t, wic_t, b_ih,
      whh_t, b_hh, wout_t, b_out, emb)

    decoder_outputs = jnp.transpose(logp, (1, 0, 2))    # (B, T, V) log-probs
    decoder_hidden = hid[None]                          # (1, B, H)
    attentions = attn.reshape(T * B, S)                 # torch.cat(attn, dim=0)
    return decoder_outputs, decoder_hidden, attentions


def _reference_forward(params, encoder_outputs, encoder_hidden,
                       target_tensor=None):
    """Pure-JAX mirror of the PyTorch AttnDecoderRNN.forward (eval mode)."""
    hp = jax.lax.Precision.HIGHEST
    keys = encoder_outputs
    B, S, H = keys.shape
    emb = params["emb"]
    wa_w, wa_b = params["wa_w"], params["wa_b"]
    ua_w, ua_b = params["ua_w"], params["ua_b"]
    va_w, va_b = params["va_w"], params["va_b"]
    w_ih, b_ih = params["gru_w_ih"], params["gru_b_ih"]
    w_hh, b_hh = params["gru_w_hh"], params["gru_b_hh"]
    out_w, out_b = params["out_w"], params["out_b"]

    hidden = encoder_hidden[0]                              # (B, H)
    dec_in = jnp.full((B,), SOS_token, jnp.int32)
    outs, attns = [], []
    for i in range(MAX_LENGTH):
        embedded = emb[dec_in]                              # (B, H)
        wq = jnp.dot(hidden, wa_w.T, precision=hp) + wa_b
        uk = jnp.einsum("bsh,oh->bso", keys, ua_w, precision=hp) + ua_b
        e = jnp.tanh(wq[:, None, :] + uk)
        scores = jnp.einsum("bsh,oh->bso", e, va_w, precision=hp)[..., 0] + va_b
        attn = jax.nn.softmax(scores, axis=-1)
        ctx = jnp.einsum("bs,bsh->bh", attn, keys, precision=hp)
        x = jnp.concatenate([embedded, ctx], axis=-1)
        gx = jnp.dot(x, w_ih.T, precision=hp) + b_ih
        gh = jnp.dot(hidden, w_hh.T, precision=hp) + b_hh
        r = jax.nn.sigmoid(gx[:, :H] + gh[:, :H])
        z = jax.nn.sigmoid(gx[:, H:2 * H] + gh[:, H:2 * H])
        n = jnp.tanh(gx[:, 2 * H:] + r * gh[:, 2 * H:])
        hidden = (1.0 - z) * n + z * hidden
        logits = jnp.dot(hidden, out_w.T, precision=hp) + out_b
        outs.append(logits)
        attns.append(attn)
        if target_tensor is not None:
            dec_in = target_tensor[:, i]
        else:
            dec_in = jnp.argmax(logits, axis=-1)
    decoder_outputs = jax.nn.log_softmax(jnp.stack(outs, axis=1), axis=-1)
    return decoder_outputs, hidden[None], jnp.concatenate(attns, axis=0)


if __name__ == "__main__":
    B, S, H, V = 32, 8, 32, 128          # batch, src seq, hidden, output vocab
    key = jax.random.PRNGKey(0)
    ks = jax.random.split(key, 16)

    def unif(k, shape, fan_in):
        b = 1.0 / float(fan_in) ** 0.5
        return jax.random.uniform(k, shape, jnp.float32, -b, b)

    params = dict(
        emb=jax.random.normal(ks[0], (V, H), jnp.float32),
        wa_w=unif(ks[1], (H, H), H), wa_b=unif(ks[2], (H,), H),
        ua_w=unif(ks[3], (H, H), H), ua_b=unif(ks[4], (H,), H),
        va_w=unif(ks[5], (1, H), H), va_b=unif(ks[6], (1,), H),
        gru_w_ih=unif(ks[7], (3 * H, 2 * H), H), gru_b_ih=unif(ks[8], (3 * H,), H),
        gru_w_hh=unif(ks[9], (3 * H, H), H), gru_b_hh=unif(ks[10], (3 * H,), H),
        out_w=unif(ks[11], (V, H), H), out_b=unif(ks[12], (V,), H),
    )
    encoder_outputs = jax.random.normal(ks[13], (B, S, H), jnp.float32)
    encoder_hidden = jax.random.normal(ks[14], (1, B, H), jnp.float32)
    targets = jax.random.randint(ks[15], (B, MAX_LENGTH), 0, V, jnp.int32)

    # --- teacher-forced, exact reciprocal: strict check against reference ---
    out_x, hid_x, att_x = attn_decoder_forward(
        params, encoder_outputs, encoder_hidden, targets, approx_recip=False)
    jax.block_until_ready((out_x, hid_x, att_x))
    out_r, hid_r, att_r = _reference_forward(
        params, encoder_outputs, encoder_hidden, targets)
    assert out_x.shape == (B, MAX_LENGTH, V)
    assert hid_x.shape == (1, B, H)
    assert att_x.shape == (MAX_LENGTH * B, S)
    assert jnp.allclose(out_x, out_r, atol=1e-3, rtol=1e-3)
    assert jnp.allclose(hid_x, hid_r, atol=1e-3, rtol=1e-3)
    assert jnp.allclose(att_x, att_r, atol=1e-3, rtol=1e-3)

    # --- teacher-forced, default approx EUP reciprocal (looser tolerances) ---
    out_a, hid_a, att_a = attn_decoder_forward(
        params, encoder_outputs, encoder_hidden, targets)
    jax.block_until_ready((out_a, hid_a, att_a))
    assert jnp.allclose(att_a.sum(axis=-1), 1.0, atol=1e-2)
    assert jnp.allclose(out_a, out_r, atol=1e-1, rtol=1e-1)
    assert jnp.allclose(hid_a, hid_r, atol=5e-2, rtol=5e-2)

    # --- greedy decode (exact recip); step 0 is decode-path independent ---
    out_g, hid_g, att_g = attn_decoder_forward(
        params, encoder_outputs, encoder_hidden, None, approx_recip=False)
    jax.block_until_ready((out_g, hid_g, att_g))
    out_gr, hid_gr, att_gr = _reference_forward(
        params, encoder_outputs, encoder_hidden, None)
    assert jnp.allclose(out_g[:, 0], out_gr[:, 0], atol=1e-3, rtol=1e-3)
    assert jnp.allclose(att_g[:B], att_gr[:B], atol=1e-3, rtol=1e-3)
    assert bool(jnp.all(jnp.isfinite(out_g)))

    # --- exercise the 2-batch-tile (megacore-parallel) path as well ---
    out_2, hid_2, att_2 = attn_decoder_forward(
        params, encoder_outputs, encoder_hidden, targets,
        num_batch_tiles=2, approx_recip=False)
    jax.block_until_ready((out_2, hid_2, att_2))
    assert jnp.allclose(out_2, out_r, atol=1e-3, rtol=1e-3)
    assert jnp.allclose(att_2, att_r, atol=1e-3, rtol=1e-3)

    print("KERNEL_OK")
</pallas_src>

<mosaic_0001>
module attributes {stable_mosaic.version = 11 : i64} {
  func.func @_decode_kernel(%arg0: i32, %arg1: i32, %arg2: memref<1x32x32xf32, #tpu.memory_space<vmem>>, %arg3: memref<32x8x32xf32, #tpu.memory_space<vmem>>, %arg4: memref<32x8x32xf32, #tpu.memory_space<vmem>>, %arg5: memref<32x32xf32, #tpu.memory_space<vmem>>, %arg6: memref<32x32xf32, #tpu.memory_space<vmem>>, %arg7: memref<1x32xf32, #tpu.memory_space<vmem>>, %arg8: memref<32x96xf32, #tpu.memory_space<vmem>>, %arg9: memref<32x96xf32, #tpu.memory_space<vmem>>, %arg10: memref<1x96xf32, #tpu.memory_space<vmem>>, %arg11: memref<32x96xf32, #tpu.memory_space<vmem>>, %arg12: memref<1x96xf32, #tpu.memory_space<vmem>>, %arg13: memref<32x128xf32, #tpu.memory_space<vmem>>, %arg14: memref<1x128xf32, #tpu.memory_space<vmem>>, %arg15: memref<128x32xf32, #tpu.memory_space<vmem>>, %arg16: memref<1x32x128xf32, #tpu.memory_space<vmem>>, %arg17: memref<1x32x8xf32, #tpu.memory_space<vmem>>, %arg18: memref<32x32xf32, #tpu.memory_space<vmem>>, %arg19: memref<32x32xf32, #tpu.memory_space<vmem>>, %arg20: memref<32x32xf32, #tpu.memory_space<vmem>>) attributes {dimension_semantics = [#tpu.dimension_semantics<parallel>, #tpu.dimension_semantics<arbitrary>], iteration_bounds = array<i64: 1, 10>, scalar_prefetch = 0 : i64, scratch_operands = 2 : i64, tpu.core_type = #tpu.core_type<tc>, window_params = [{transform_indices = @transform_0, window_bounds = array<i64: 1, 32, 32>}, {transform_indices = @transform_1, window_bounds = array<i64: 32, 8, 32>}, {transform_indices = @transform_2, window_bounds = array<i64: 32, 8, 32>}, {transform_indices = @transform_3, window_bounds = array<i64: 32, 32>}, {pipeline_mode = #tpu.pipeline_mode<synchronous>, transform_indices = @transform_4, window_bounds = array<i64: 32, 32>}, {pipeline_mode = #tpu.pipeline_mode<synchronous>, transform_indices = @transform_5, window_bounds = array<i64: 1, 32>}, {pipeline_mode = #tpu.pipeline_mode<synchronous>, transform_indices = @transform_6, window_bounds = array<i64: 32, 96>}, {pipeline_mode = #tpu.pipeline_mode<synchronous>, transform_indices = @transform_7, window_bounds = array<i64: 32, 96>}, {pipeline_mode = #tpu.pipeline_mode<synchronous>, transform_indices = @transform_8, window_bounds = array<i64: 1, 96>}, {pipeline_mode = #tpu.pipeline_mode<synchronous>, transform_indices = @transform_9, window_bounds = array<i64: 32, 96>}, {pipeline_mode = #tpu.pipeline_mode<synchronous>, transform_indices = @transform_10, window_bounds = array<i64: 1, 96>}, {pipeline_mode = #tpu.pipeline_mode<synchronous>, transform_indices = @transform_11, window_bounds = array<i64: 32, 128>}, {pipeline_mode = #tpu.pipeline_mode<synchronous>, transform_indices = @transform_12, window_bounds = array<i64: 1, 128>}, {pipeline_mode = #tpu.pipeline_mode<synchronous>, transform_indices = @transform_13, window_bounds = array<i64: 128, 32>}, {transform_indices = @transform_14, window_bounds = array<i64: 1, 32, 128>}, {transform_indices = @transform_15, window_bounds = array<i64: 1, 32, 8>}, {transform_indices = @transform_16, window_bounds = array<i64: 32, 32>}]} {
    %c0_i32 = arith.constant 0 : i32
    %0 = arith.cmpi eq, %arg1, %c0_i32 : i32
    %1 = arith.extui %0 : i1 to i32
    %c0_i32_0 = arith.constant 0 : i32
    %2 = arith.cmpi ne, %1, %c0_i32_0 : i32
    scf.if %2 {
      %c0_52 = arith.constant 0 : index
      %c0_53 = arith.constant 0 : index
      %95 = vector.load %arg5[%c0_52, %c0_53] : memref<32x32xf32, #tpu.memory_space<vmem>>, vector<32x32xf32>
      %c0_54 = arith.constant 0 : index
      %c0_55 = arith.constant 0 : index
      %96 = vector.load %arg19[%c0_54, %c0_55] : memref<32x32xf32, #tpu.memory_space<vmem>>, vector<32x32xf32>
      tpu.vector_store %arg19[%c0_54, %c0_55], %95 {strides = array<i32>} : memref<32x32xf32, #tpu.memory_space<vmem>>, vector<32x32xf32>,
    } else {
    }
    %c0 = arith.constant 0 : index
    %c0_1 = arith.constant 0 : index
    %3 = vector.load %arg19[%c0, %c0_1] : memref<32x32xf32, #tpu.memory_space<vmem>>, vector<32x32xf32>
    %c0_2 = arith.constant 0 : index
    %c0_3 = arith.constant 0 : index
    %c0_4 = arith.constant 0 : index
    %4 = vector.load %arg2[%c0_2, %c0_3, %c0_4] : memref<1x32x32xf32, #tpu.memory_space<vmem>>, vector<1x32x32xf32>
    %5 = vector.shape_cast %4 : vector<1x32x32xf32> to vector<32x32xf32>
    %c0_5 = arith.constant 0 : index
    %c0_6 = arith.constant 0 : index
    %6 = vector.load %arg6[%c0_5, %c0_6] : memref<32x32xf32, #tpu.memory_space<vmem>>, vector<32x32xf32>
    %cst = arith.constant dense<0.000000e+00> : vector<32x32xf32>
    %7 = tpu.matmul %3, %6, %cst {dimension_numbers = #tpu.dot_dimension_numbers<[1], [0], [0], [1], [0, 0, 1, 1], [], []>} : vector<32x32xf32>, vector<32x32xf32>, vector<32x32xf32> -> vector<32x32xf32>
    %8 = vector.shape_cast %7 : vector<32x32xf32> to vector<32x1x32xf32>
    %c0_7 = arith.constant 0 : index
    %c0_8 = arith.constant 0 : index
    %c0_9 = arith.constant 0 : index
    %9 = vector.load %arg4[%c0_7, %c0_8, %c0_9] : memref<32x8x32xf32, #tpu.memory_space<vmem>>, vector<32x8x32xf32>
    %10 = vector.broadcast %8 : vector<32x1x32xf32> to vector<32x8x32xf32>
    %11 = arith.addf %10, %9 : vector<32x8x32xf32>
    %12 = math.tanh %11 : vector<32x8x32xf32>
    %c0_10 = arith.constant 0 : index
    %c0_11 = arith.constant 0 : index
    %13 = vector.load %arg7[%c0_10, %c0_11] : memref<1x32xf32, #tpu.memory_space<vmem>>, vector<1x32xf32>
    %14 = vector.shape_cast %13 : vector<1x32xf32> to vector<1x1x32xf32>
    %15 = vector.broadcast %14 : vector<1x1x32xf32> to vector<32x8x32xf32>
    %16 = arith.mulf %12, %15 : vector<32x8x32xf32>
    %cst_12 = arith.constant dense<0.000000e+00> : vector<32x8xf32>
    %17 = vector.multi_reduction <add>, %16, %cst_12 [2] : vector<32x8x32xf32> to vector<32x8xf32>
    %cst_13 = arith.constant dense<0xFF800000> : vector<32xf32>
    %18 = vector.multi_reduction <maximumf>, %17, %cst_13 [1] : vector<32x8xf32> to vector<32xf32>
    %19 = vector.shape_cast %18 : vector<32xf32> to vector<32x1xf32>
    %20 = vector.broadcast %19 : vector<32x1xf32> to vector<32x8xf32>
    %21 = arith.subf %17, %20 : vector<32x8xf32>
    %22 = math.exp %21 : vector<32x8xf32>
    %cst_14 = arith.constant dense<0.000000e+00> : vector<32xf32>
    %23 = vector.multi_reduction <add>, %22, %cst_14 [1] : vector<32x8xf32> to vector<32xf32>
    %24 = vector.shape_cast %23 : vector<32xf32> to vector<32x1xf32>
    %25 = tpu.reciprocal %24 : vector<32x1xf32> -> vector<32x1xf32>
    %26 = vector.broadcast %25 : vector<32x1xf32> to vector<32x8xf32>
    %27 = arith.mulf %22, %26 : vector<32x8xf32>
    %28 = vector.shape_cast %27 : vector<32x8xf32> to vector<32x8x1xf32>
    %c0_15 = arith.constant 0 : index
    %c0_16 = arith.constant 0 : index
    %c0_17 = arith.constant 0 : index
    %29 = vector.load %arg3[%c0_15, %c0_16, %c0_17] : memref<32x8x32xf32, #tpu.memory_space<vmem>>, vector<32x8x32xf32>
    %30 = vector.broadcast %28 : vector<32x8x1xf32> to vector<32x8x32xf32>
    %31 = arith.mulf %30, %29 : vector<32x8x32xf32>
    %cst_18 = arith.constant dense<0.000000e+00> : vector<32x32xf32>
    %32 = vector.multi_reduction <add>, %31, %cst_18 [1] : vector<32x8x32xf32> to vector<32x32xf32>
    %c0_19 = arith.constant 0 : index
    %c0_20 = arith.constant 0 : index
    %33 = vector.load %arg8[%c0_19, %c0_20] : memref<32x96xf32, #tpu.memory_space<vmem>>, vector<32x96xf32>
    %cst_21 = arith.constant dense<0.000000e+00> : vector<32x96xf32>
    %34 = tpu.matmul %5, %33, %cst_21 {dimension_numbers = #tpu.dot_dimension_numbers<[1], [0], [0], [1], [0, 0, 1, 1], [], []>} : vector<32x32xf32>, vector<32x96xf32>, vector<32x96xf32> -> vector<32x96xf32>
    %c0_22 = arith.constant 0 : index
    %c0_23 = arith.constant 0 : index
    %35 = vector.load %arg9[%c0_22, %c0_23] : memref<32x96xf32, #tpu.memory_space<vmem>>, vector<32x96xf32>
    %cst_24 = arith.constant dense<0.000000e+00> : vector<32x96xf32>
    %36 = tpu.matmul %32, %35, %cst_24 {dimension_numbers = #tpu.dot_dimension_numbers<[1], [0], [0], [1], [0, 0, 1, 1], [], []>} : vector<32x32xf32>, vector<32x96xf32>, vector<32x96xf32> -> vector<32x96xf32>
    %37 = arith.addf %34, %36 : vector<32x96xf32>
    %c0_25 = arith.constant 0 : index
    %c0_26 = arith.constant 0 : index
    %38 = vector.load %arg10[%c0_25, %c0_26] : memref<1x96xf32, #tpu.memory_space<vmem>>, vector<1x96xf32>
    %39 = vector.broadcast %38 : vector<1x96xf32> to vector<32x96xf32>
    %40 = arith.addf %37, %39 : vector<32x96xf32>
    %c0_27 = arith.constant 0 : index
    %c0_28 = arith.constant 0 : index
    %41 = vector.load %arg11[%c0_27, %c0_28] : memref<32x96xf32, #tpu.memory_space<vmem>>, vector<32x96xf32>
    %cst_29 = arith.constant dense<0.000000e+00> : vector<32x96xf32>
    %42 = tpu.matmul %3, %41, %cst_29 {dimension_numbers = #tpu.dot_dimension_numbers<[1], [0], [0], [1], [0, 0, 1, 1], [], []>} : vector<32x32xf32>, vector<32x96xf32>, vector<32x96xf32> -> vector<32x96xf32>
    %c0_30 = arith.constant 0 : index
    %c0_31 = arith.constant 0 : index
    %43 = vector.load %arg12[%c0_30, %c0_31] : memref<1x96xf32, #tpu.memory_space<vmem>>, vector<1x96xf32>
    %44 = vector.broadcast %43 : vector<1x96xf32> to vector<32x96xf32>
    %45 = arith.addf %42, %44 : vector<32x96xf32>
    %46 = vector.extract_strided_slice %40 {offsets = [0, 0], sizes = [32, 32], strides = [1, 1]} : vector<32x96xf32> to vector<32x32xf32>
    %47 = vector.extract_strided_slice %45 {offsets = [0, 0], sizes = [32, 32], strides = [1, 1]} : vector<32x96xf32> to vector<32x32xf32>
    %48 = arith.addf %46, %47 : vector<32x32xf32>
    %49 = arith.negf %48 : vector<32x32xf32>
    %50 = math.exp %49 : vector<32x32xf32>
    %cst_32 = arith.constant 1.000000e+00 : f32
    %51 = vector.broadcast %cst_32 : f32 to vector<32x32xf32>
    %52 = arith.addf %51, %50 : vector<32x32xf32>
    %53 = arith.divf %51, %52 : vector<32x32xf32>
    %54 = vector.extract_strided_slice %40 {offsets = [0, 32], sizes = [32, 32], strides = [1, 1]} : vector<32x96xf32> to vector<32x32xf32>
    %55 = vector.extract_strided_slice %45 {offsets = [0, 32], sizes = [32, 32], strides = [1, 1]} : vector<32x96xf32> to vector<32x32xf32>
    %56 = arith.addf %54, %55 : vector<32x32xf32>
    %57 = arith.negf %56 : vector<32x32xf32>
    %58 = math.exp %57 : vector<32x32xf32>
    %cst_33 = arith.constant 1.000000e+00 : f32
    %59 = vector.broadcast %cst_33 : f32 to vector<32x32xf32>
    %60 = arith.addf %59, %58 : vector<32x32xf32>
    %61 = arith.divf %59, %60 : vector<32x32xf32>
    %62 = vector.extract_strided_slice %40 {offsets = [0, 64], sizes = [32, 32], strides = [1, 1]} : vector<32x96xf32> to vector<32x32xf32>
    %63 = vector.extract_strided_slice %45 {offsets = [0, 64], sizes = [32, 32], strides = [1, 1]} : vector<32x96xf32> to vector<32x32xf32>
    %64 = arith.mulf %53, %63 : vector<32x32xf32>
    %65 = arith.addf %62, %64 : vector<32x32xf32>
    %66 = math.tanh %65 : vector<32x32xf32>
    %cst_34 = arith.constant 1.000000e+00 : f32
    %67 = vector.broadcast %cst_34 : f32 to vector<32x32xf32>
    %68 = arith.subf %67, %61 : vector<32x32xf32>
    %69 = arith.mulf %68, %66 : vector<32x32xf32>
    %70 = arith.mulf %61, %3 : vector<32x32xf32>
    %71 = arith.addf %69, %70 : vector<32x32xf32>
    %c0_35 = arith.constant 0 : index
    %c0_36 = arith.constant 0 : index
    %72 = vector.load %arg13[%c0_35, %c0_36] : memref<32x128xf32, #tpu.memory_space<vmem>>, vector<32x128xf32>
    %cst_37 = arith.constant dense<0.000000e+00> : vector<32x128xf32>
    %73 = tpu.matmul %71, %72, %cst_37 {dimension_numbers = #tpu.dot_dimension_numbers<[1], [0], [0], [1], [0, 0, 1, 1], [], []>} : vector<32x32xf32>, vector<32x128xf32>, vector<32x128xf32> -> vector<32x128xf32>
    %c0_38 = arith.constant 0 : index
    %c0_39 = arith.constant 0 : index
    %74 = vector.load %arg14[%c0_38, %c0_39] : memref<1x128xf32, #tpu.memory_space<vmem>>, vector<1x128xf32>
    %75 = vector.broadcast %74 : vector<1x128xf32> to vector<32x128xf32>
    %76 = arith.addf %73, %75 : vector<32x128xf32>
    %cst_40 = arith.constant dense<0xFF800000> : vector<32xf32>
    %77 = vector.multi_reduction <maximumf>, %76, %cst_40 [1] : vector<32x128xf32> to vector<32xf32>
    %78 = vector.shape_cast %77 : vector<32xf32> to vector<32x1xf32>
    %79 = vector.broadcast %78 : vector<32x1xf32> to vector<32x128xf32>
    %80 = arith.subf %76, %79 : vector<32x128xf32>
    %81 = math.exp %80 : vector<32x128xf32>
    %cst_41 = arith.constant dense<0.000000e+00> : vector<32xf32>
    %82 = vector.multi_reduction <add>, %81, %cst_41 [1] : vector<32x128xf32> to vector<32xf32>
    %83 = vector.shape_cast %82 : vector<32xf32> to vector<32x1xf32>
    %84 = math.log %83 : vector<32x1xf32>
    %85 = vector.broadcast %84 : vector<32x1xf32> to vector<32x128xf32>
    %86 = arith.subf %80, %85 : vector<32x128xf32>
    %c0_42 = arith.constant 0 : index
    %c0_43 = arith.constant 0 : index
    %87 = vector.load %arg19[%c0_42, %c0_43] : memref<32x32xf32, #tpu.memory_space<vmem>>, vector<32x32xf32>
    tpu.vector_store %arg19[%c0_42, %c0_43], %71 {strides = array<i32>} : memref<32x32xf32, #tpu.memory_space<vmem>>, vector<32x32xf32>,
    %c0_44 = arith.constant 0 : index
    %c0_45 = arith.constant 0 : index
    %c0_46 = arith.constant 0 : index
    %88 = vector.load %arg16[%c0_44, %c0_45, %c0_46] : memref<1x32x128xf32, #tpu.memory_space<vmem>>, vector<1x32x128xf32>
    %89 = vector.shape_cast %88 : vector<1x32x128xf32> to vector<32x128xf32>
    %90 = vector.shape_cast %86 : vector<32x128xf32> to vector<1x32x128xf32>
    tpu.vector_store %arg16[%c0_44, %c0_45, %c0_46], %90 {strides = array<i32>} : memref<1x32x128xf32, #tpu.memory_space<vmem>>, vector<1x32x128xf32>,
    %c0_47 = arith.constant 0 : index
    %c0_48 = arith.constant 0 : index
    %c0_49 = arith.constant 0 : index
    %91 = vector.load %arg17[%c0_47, %c0_48, %c0_49] : memref<1x32x8xf32, #tpu.memory_space<vmem>>, vector<1x32x8xf32>
    %92 = vector.shape_cast %91 : vector<1x32x8xf32> to vector<32x8xf32>
    %93 = vector.shape_cast %27 : vector<32x8xf32> to vector<1x32x8xf32>
    tpu.vector_store %arg17[%c0_47, %c0_48, %c0_49], %93 {strides = array<i32>} : memref<1x32x8xf32, #tpu.memory_space<vmem>>, vector<1x32x8xf32>,
    %c0_50 = arith.constant 0 : index
    %c0_51 = arith.constant 0 : index
    %94 = vector.load %arg18[%c0_50, %c0_51] : memref<32x32xf32, #tpu.memory_space<vmem>>, vector<32x32xf32>
    tpu.vector_store %arg18[%c0_50, %c0_51], %71 {strides = array<i32>} : memref<32x32xf32, #tpu.memory_space<vmem>>, vector<32x32xf32>,
    return
  }
  func.func @transform_0(%arg0: i32, %arg1: i32) -> (i32, i32, i32) {
    %c0_i32 = arith.constant 0 : i32
    %c0_i32_0 = arith.constant 0 : i32
    return %arg1, %arg0, %c0_i32 : i32, i32, i32
  }
  func.func @transform_1(%arg0: i32, %arg1: i32) -> (i32, i32, i32) {
    %c0_i32 = arith.constant 0 : i32
    %c0_i32_0 = arith.constant 0 : i32
    %c0_i32_1 = arith.constant 0 : i32
    return %arg0, %c0_i32, %c0_i32_0 : i32, i32, i32
  }
  func.func @transform_2(%arg0: i32, %arg1: i32) -> (i32, i32, i32) {
    %c0_i32 = arith.constant 0 : i32
    %c0_i32_0 = arith.constant 0 : i32
    %c0_i32_1 = arith.constant 0 : i32
    return %arg0, %c0_i32, %c0_i32_0 : i32, i32, i32
  }
  func.func @transform_3(%arg0: i32, %arg1: i32) -> (i32, i32) {
    %c0_i32 = arith.constant 0 : i32
    %c0_i32_0 = arith.constant 0 : i32
    return %arg0, %c0_i32 : i32, i32
  }
  func.func @transform_4(%arg0: i32, %arg1: i32) -> (i32, i32) {
    %c0_i32 = arith.constant 0 : i32
    %c0_i32_0 = arith.constant 0 : i32
    %c0_i32_1 = arith.constant 0 : i32
    return %c0_i32, %c0_i32_0 : i32, i32
  }
  func.func @transform_5(%arg0: i32, %arg1: i32) -> (i32, i32) {
    %c0_i32 = arith.constant 0 : i32
    %c0_i32_0 = arith.constant 0 : i32
    %c0_i32_1 = arith.constant 0 : i32
    return %c0_i32, %c0_i32_0 : i32, i32
  }
  func.func @transform_6(%arg0: i32, %arg1: i32) -> (i32, i32) {
    %c0_i32 = arith.constant 0 : i32
    %c0_i32_0 = arith.constant 0 : i32
    %c0_i32_1 = arith.constant 0 : i32
    return %c0_i32, %c0_i32_0 : i32, i32
  }
  func.func @transform_7(%arg0: i32, %arg1: i32) -> (i32, i32) {
    %c0_i32 = arith.constant 0 : i32
    %c0_i32_0 = arith.constant 0 : i32
    %c0_i32_1 = arith.constant 0 : i32
    return %c0_i32, %c0_i32_0 : i32, i32
  }
  func.func @transform_8(%arg0: i32, %arg1: i32) -> (i32, i32) {
    %c0_i32 = arith.constant 0 : i32
    %c0_i32_0 = arith.constant 0 : i32
    %c0_i32_1 = arith.constant 0 : i32
    return %c0_i32, %c0_i32_0 : i32, i32
  }
  func.func @transform_9(%arg0: i32, %arg1: i32) -> (i32, i32) {
    %c0_i32 = arith.constant 0 : i32
    %c0_i32_0 = arith.constant 0 : i32
    %c0_i32_1 = arith.constant 0 : i32
    return %c0_i32, %c0_i32_0 : i32, i32
  }
  func.func @transform_10(%arg0: i32, %arg1: i32) -> (i32, i32) {
    %c0_i32 = arith.constant 0 : i32
    %c0_i32_0 = arith.constant 0 : i32
    %c0_i32_1 = arith.constant 0 : i32
    return %c0_i32, %c0_i32_0 : i32, i32
  }
  func.func @transform_11(%arg0: i32, %arg1: i32) -> (i32, i32) {
    %c0_i32 = arith.constant 0 : i32
    %c0_i32_0 = arith.constant 0 : i32
    %c0_i32_1 = arith.constant 0 : i32
    return %c0_i32, %c0_i32_0 : i32, i32
  }
  func.func @transform_12(%arg0: i32, %arg1: i32) -> (i32, i32) {
    %c0_i32 = arith.constant 0 : i32
    %c0_i32_0 = arith.constant 0 : i32
    %c0_i32_1 = arith.constant 0 : i32
    return %c0_i32, %c0_i32_0 : i32, i32
  }
  func.func @transform_13(%arg0: i32, %arg1: i32) -> (i32, i32) {
    %c0_i32 = arith.constant 0 : i32
    %c0_i32_0 = arith.constant 0 : i32
    %c0_i32_1 = arith.constant 0 : i32
    return %c0_i32, %c0_i32_0 : i32, i32
  }
  func.func @transform_14(%arg0: i32, %arg1: i32) -> (i32, i32, i32) {
    %c0_i32 = arith.constant 0 : i32
    %c0_i32_0 = arith.constant 0 : i32
    return %arg1, %arg0, %c0_i32 : i32, i32, i32
  }
  func.func @transform_15(%arg0: i32, %arg1: i32) -> (i32, i32, i32) {
    %c0_i32 = arith.constant 0 : i32
    %c0_i32_0 = arith.constant 0 : i32
    return %arg1, %arg0, %c0_i32 : i32, i32, i32
  }
  func.func @transform_16(%arg0: i32, %arg1: i32) -> (i32, i32) {
    %c0_i32 = arith.constant 0 : i32
    %c0_i32_0 = arith.constant 0 : i32
    return %arg0, %c0_i32 : i32, i32
  }
}

</mosaic_0001>

<bundles_post_ra>
// kernel: tpu_custom_call.1
= control target key start
LH: loop header
LB: loop body
LE: loop exit
PB: predicated region body
PF: predicated region fallthrough
CT: control target
= control target key end

     0   :  { %s4690_s0 = inlined_call_operand.hbm [shape: f32[10,32,32], index: 0, kind: input, shape index: {}]   ;;  %s4691_s1 = inlined_call_operand.hbm [shape: f32[32,8,32], index: 1, kind: input, shape index: {}]   ;;  %s4692_s2 = inlined_call_operand.hbm [shape: f32[32,8,32], index: 2, kind: input, shape index: {}]   ;;  %s4693_s3 = inlined_call_operand.vmem [shape: f32[32,32], index: 3, kind: input, shape index: {}]   ;;  %s4694_s4 = inlined_call_operand.vmem [shape: f32[32,32], index: 4, kind: input, shape index: {}]   ;;  %s4695_s5 = inlined_call_operand.vmem [shape: f32[1,32], index: 5, kind: input, shape index: {}]   ;;  %s4696_s6 = inlined_call_operand.vmem [shape: f32[32,96], index: 6, kind: input, shape index: {}]   ;;  %s4697_s7 = inlined_call_operand.vmem [shape: f32[32,96], index: 7, kind: input, shape index: {}]   ;;  %s4698_s8 = inlined_call_operand.vmem [shape: f32[1,96], index: 8, kind: input, shape index: {}]   ;;  %s4699_s9 = inlined_call_operand.vmem [shape: f32[32,96], index: 9, kind: input, shape index: {}]   ;;  %s4700_s10 = inlined_call_operand.vmem [shape: f32[1,96], index: 10, kind: input, shape index: {}]   ;;  %s4701_s11 = inlined_call_operand.hbm [shape: f32[32,128], index: 11, kind: input, shape index: {}]   ;;  %s4702_s12 = inlined_call_operand.vmem [shape: f32[1,128], index: 12, kind: input, shape index: {}]   ;;  %s4703_s13 = inlined_call_operand.vmem [shape: f32[128,32], index: 13, kind: input, shape index: {}]   ;;  %s4704_s14 = inlined_call_operand.hbm [shape: f32[10,32,128], index: 14, kind: output, shape index: {0}]   ;;  %s4705_s15 = inlined_call_operand.vmem [shape: f32[10,32,8], index: 15, kind: output, shape index: {1}]   ;;  %s4706_s16 = inlined_call_operand.hbm [shape: f32[32,32], index: 16, kind: output, shape index: {2}]  }
   0x1   :  { %4719 = sst [smem:[#allocation26_spill]] %s4690_s0 }
   0x2   :  { %4720 = sst [smem:[#allocation27_spill]] %s4691_s1 }
   0x3   :  { %4721 = sst [smem:[#allocation28_spill]] %s4692_s2 }
   0x4   :  { %4722 = sst [smem:[#allocation29_spill]] %s4698_s8 }
   0x5   :  { %4723 = sst [smem:[#allocation30_spill]] %s4700_s10 }
   0x6   :  { %4724 = sst [smem:[#allocation31_spill]] %s4701_s11 }
   0x7   :  { %4725 = sst [smem:[#allocation32_spill]] %s4702_s12 }
   0x8   :  { %4726 = sst [smem:[#allocation33_spill]] %s4704_s14 }
   0x9   :  { %4727 = sst [smem:[#allocation34_spill]] %s4706_s16 }
   0xa   :  { %22 = vsyncpa [#allocation5], 0 }
   0xb   :  { %24 = vsyncpa [#allocation5 + $0x1], 0 }
   0xc   :  { %25 = vsyncpa [#allocation8], 0 }
   0xd   :  { %26 = vsyncpa [#allocation11], 0 }
   0xe   :  { %27 = vsyncpa [#allocation6], 0 }
   0xf   :  { %29 = vsyncpa [#allocation6 + $0x1], 0 }
  0x10   :  { %30 = vsyncpa [#allocation14], 0  ;;  %s3641_s21 = smov 0   ;;  %s3643_s22 = smov 0  }
  0x11   :  { %s3645_s13 = smov 0   ;;  %s3647_s23 = smov 0  }
  0x12   :  { %s3649_s24 = smov 0   ;;  %s3651_s25 = smov 0  }
  0x13 LB: > { %4728 = sst [smem:[#allocation20_spill]] %s3522_s21  ;;  %s2935_s26 = sadd.s32 4294967295, %s3542_s25   ;;  %s3542_s25 = sphi %s3651_s25, %s36_s25   ;;  %s3538_s24 = sphi %s3649_s24, %s4764_s24   ;;  %s3534_s23 = sphi %s3647_s23, %s4763_s23   ;;  %s3530_s13 = sphi %s3645_s13, %s4762_s13   ;;  %s3526_s22 = sphi %s3643_s22, %s4761_s22   ;;  %s3522_s21 = sphi %s3641_s21, %s4760_s21  }
  0x14   : > { %4729 = sst [smem:[#allocation21_spill]] %s3542_s25  ;;  %s2936_s27 = sadd.s32 4294967294, %s3542_s25  }
  0x15   : > { %p70_p0 = scmp.ne.s32.totalorder %s3526_s22, %s3522_s21  ;;  %p3675_p1 = scmp.eq.s32.totalorder %s2935_s26, 0 }
  0x16   : > { %p3679_p2 = scmp.eq.s32.totalorder %s2935_s26, 9  ;;  %p390_p3 = scmp.eq.s32.totalorder %s2936_s27, 9 }
  0x17   : > { %p3685_p4 = por %p3675_p1, %p70_p0  ;;  %p2937_p5 = scmp.ge.s32.totalorder %s3542_s25, 1 }
  0x18   : > { %s4731_s29 = scalar_select %p3679_p2, 1, 0 }
  0x19   : > { %p3690_p6 = por %p390_p3, %p70_p0  ;;  %p451_p7 = scmp.lt.s32.totalorder %s3542_s25, 11 }
  0x1a   : > { %4732 = sst [smem:[#allocation22_spill]] %s4731_s29  ;;  %s3544_s26 = smov [#allocation7]  }
  0x1b   : > { %s4734_s0 = scalar_select %p3690_p6, 1, 0 }
  0x1c   : > { %s4736_s1 = sld [smem:[#allocation27_spill]]  ;;  %p3698_p8 = pnand %p2937_p5, %p451_p7 }
  0x1d   : > { %4735 = sst [smem:[#allocation23_spill]] %s4734_s0  ;;  %s467_s27 = sshll.u32 %s3544_s26, 4  ;;  %s468_s27 = int_to_ptr.vmem [resolvable:$true] %s467_s27 }
  0x1e   : > { %p3021_p9 = pneg %p3698_p8  ;;  %s4739_s2 = sld [smem:[#allocation28_spill]] }
  0x1f   : > { %s4710_s18 = smov 128   ;;  %s4711_s26 = smov 8  }
  0x20   : > { %p3706_p10 = pnand %p3021_p9, %p3675_p1  ;;  %s4740_s11 = sld [smem:[#allocation31_spill]] }
  0x21   : > { %p64_p12 = scmp.ne.s32.totalorder %s3530_s13, %s3526_s22  ;;  %p65_p13 = scmp.eq.s32.totalorder %s3542_s25, 0 }
  0x22   : > { %s465_s19 = sshll.u32 %s4736_s1, 4  ;;  %s3547_s1 = smov [#allocation9]   ;;  %s466_s19 = int_to_ptr.hbm [resolvable:$true] %s465_s19 }
  0x23   : > { %3024 = dma.hbm_to_vmem [thread:$0]  (!%p3706_p10), %s466_s19, 4096, %s468_s27, [#allocation8], %s4710_s18, %s4710_s18, %s4711_s26  }
  0x24   : > { %s482_s17 = sshll.u32 %s4739_s2, 4  ;;  %s484_s16 = sshll.u32 %s3547_s1, 4  ;;  %s483_s17 = int_to_ptr.hbm [resolvable:$true] %s482_s17  ;;  %s485_s16 = int_to_ptr.vmem [resolvable:$true] %s484_s16 }
  0x25   : > { %3027 = dma.hbm_to_vmem [thread:$0]  (!%p3706_p10), %s483_s17, 4096, %s485_s16, [#allocation8], %s4710_s18, %s4710_s18, %s4711_s26  }
  0x26   : > { %s526_s12 = sshll.u32 %s4740_s11, 4  ;;  %s3548_s2 = smov [#allocation10]   ;;  %s527_s12 = int_to_ptr.hbm [resolvable:$true] %s526_s12 }
  0x27   : > { %s528_s8 = sshll.u32 %s3548_s2, 4  ;;  %s45_s1 = sadd.s32 1, %s3538_s24  ;;  %s529_s8 = int_to_ptr.vmem [resolvable:$true] %s528_s8 }
  0x28   : > { %3030 = dma.hbm_to_vmem [thread:$0]  (!%p3706_p10), %s527_s12, 512, %s529_s8, [#allocation11], %s4710_s18, %s4710_s18, %s4711_s26  }
  0x29   : > { %p46_p11 = scmp.ge.s32.totalorder %s45_s1, 10  ;;  %s57_s19 = sadd.s32 1, %s3530_s13 }
  0x2a   : > { %p3738_p0 = por %p65_p13, %p64_p12  ;;  %p3744_p3 = por %p3679_p2, %p64_p12 }
  0x2b   : > { %s4766_s1 = smov (%p46_p11, %s45_s1), 0  ;;  %p3042_p5 = scmp.lt.s32.totalorder %s3542_s25, 10 }
  0x2c   : > { %4741 = sst [smem:[#allocation24_spill]] %s4766_s1  ;;  %s52_s21 = ssub.s32 %s3538_s24, %s4766_s1 }
  0x2d   : > { %s4743_s2 = scalar_select %p3744_p3, 1, 0 }
  0x2e   : > { %p55_p7 = scmp.eq.s32.totalorder %s52_s21, 0  ;;  %s548_s8 = sand.u32 1, %s3530_s13  }
  0x2f   : > { %4744 = sst [smem:[#allocation25_spill]] %s4743_s2  ;;  %s2943_s12 = sshll.u32 %s548_s8, 5 }
  0x30   : > { %s3753_s27 = scalar_select %p55_p7, %s3530_s13, %s57_s19  }
  0x31   : > { %s2986_s17 = sshll.u32 %s3538_s24, 5  ;;  %s4745_s18 = sld [smem:[#allocation26_spill]] }
  0x32   : > { %s552_s11 = scalar_lea.vmem [#allocation4], %s2943_s12  ;;  %p3032_p9 = pnand %p3042_p5, %p3738_p0 }
  0x33   : > { %s562_s10 = sshll.u32 %s552_s11, 4  ;;  %s549_s2 = scalar_lea.sflag [#allocation5], %s548_s8  ;;  %s563_s10 = int_to_ptr.vmem [resolvable:$true] %s562_s10 }
  0x34   : > { %s4746_s1 = smov 8   ;;  %s4747_s25 = smov 128  }
  0x35   : > { %574 = sbr.rel (%p3698_p8) target bundleno = 1892 (0x764), region = 76  ;;  %s3767_s19 = sand.u32 (!%p3698_p8), 1, %s3526_s22  }
  0x36   : > { %s2947_s11 = sshll.u32 (!%p3698_p8), %s3767_s19, 5 }
  0x37   : > { %s559_s26 = scalar_lea.hbm %s4745_s18, %s2986_s17  ;;  %s577_s18 = scalar_lea.sflag (!%p3698_p8), [#allocation5], %s3767_s19 }
  0x38   : > { %s560_s29 = sshll.u32 %s559_s26, 4  ;;  %s3771_s26 = scalar_lea.vmem (!%p3698_p8), [#allocation4], %s2947_s11  ;;  %s561_s29 = int_to_ptr.hbm [resolvable:$true] %s560_s29 }
  0x39   : > { %3034 = dma.hbm_to_vmem [thread:$0]  (!%p3032_p9), %s561_s29, 512, %s563_s10, %s549_s2, %s4747_s25, %s4747_s25, %s4746_s1  }
  0x3a   : > { %3501 = dma.done.wait (%p3685_p4), %s577_s18, 512  }
  0x3b   : > { %3503 = vsyncadd (%p3685_p4), %s577_s18, 4294966784 }
  0x3c   : > { %3505 = dma.done.wait (%p3675_p1), [#allocation8], 8192  }
  0x3d   : > { %3507 = vsyncadd (%p3675_p1), [#allocation8], 4294959104 }
  0x3e   : > { %3509 = dma.done.wait (%p3675_p1), [#allocation11], 512  }
  0x3f   : > { %3511 = vsyncadd (%p3675_p1), [#allocation11], 4294966784  ;;  %p670_p8 = scmp.lt.s32.totalorder %s3534_s23, 9  ;;  %s3792_s1 = scalar_lea.vmem [#allocation12], %s2947_s11 }
  0x40   : > { %p2954_p4 = scmp.ne.s32.totalorder %s3534_s23, 0 }
  0x41   : > { %s671_s10 = scalar_select %p670_p8, %s3534_s23, 9 }
  0x42   : > { %683 = sbr.rel (%p2954_p4) target bundleno = 76 (0x4c), region = 96 }
  0x43   : > { %s2987_s25 = sshll.u32 %s671_s10, 5 }
  0x44   : > { %s3790_s20 = scalar_lea.vmem %s4705_s15, %s2987_s25 }
  0x47   : > { %v684_v0 = vld [vmem:[%s4693_s3] sm:$0xff]  ;;  %vm688_vm0 = vcmask 261120   ;;  %v685_v1 = vld [vmem:[%s4693_s3 + $0x8] sm:$0xff]  ;;  %v686_v2 = vld [vmem:[%s4693_s3 + $0x10] sm:$0xff] }
  0x48   : > { %689 = vst.msk [vmem:[#allocation2] sm:$0xff] %vm688_vm0, %v684_v0  ;;  %v687_v3 = vld [vmem:[%s4693_s3 + $0x18] sm:$0xff] }
  0x49   : > { %690 = vst.msk [vmem:[#allocation2 + $0x8] sm:$0xff] %vm688_vm0, %v685_v1 }
  0x4a   : > { %691 = vst.msk [vmem:[#allocation2 + $0x10] sm:$0xff] %vm688_vm0, %v686_v2 }
  0x4b   : > { %692 = vst.msk [vmem:[#allocation2 + $0x18] sm:$0xff] %vm688_vm0, %v687_v3 }
  0x4c PF: > { %v704_v4 = vld [vmem:[%s4694_s4 + $0x18] sm:$0xff]  ;;  %v703_v5 = vld [vmem:[%s4694_s4 + $0x10] sm:$0xff]  ;;  %v702_v6 = vld [vmem:[%s4694_s4 + $0x8] sm:$0xff]  ;;  %vm705_vm1 = vcmask 261120   ;;  %vm1137_vm2 = vcmask 1041409   ;;  %vm1139_vm3 = vcmask 1042434  }
  0x4d   : > { %730 = vmatpush.msra.mxu0 %v704_v4  ;;  %2989 = vmatpush.msra.mxu1 %v704_v4  ;;  %v701_v7 = vld [vmem:[%s4694_s4] sm:$0xff]  ;;  %v781_v20 = vld [vmem:[#allocation9 + $0x10] sm:$0xff]  ;;  %v780_v28 = vld [vmem:[#allocation9 + $0x8] sm:$0xff]  ;;  %vm1141_vm4 = vcmask 1043459   ;;  %vm1143_vm5 = vcmask 1044484   ;;  %vm1145_vm6 = vcmask 1045509  }
  0x4e   : > { %2990 = vmatpush.msra.mxu2 %v704_v4  ;;  %2991 = vmatpush.msra.mxu3 %v704_v4  ;;  %v787_v14 = vld [vmem:[#allocation9 + $0x40] sm:$0xff]  ;;  %v782_v30 = vld [vmem:[#allocation9 + $0x18] sm:$0xff]  ;;  %v784_v41 = vld [vmem:[#allocation9 + $0x28] sm:$0xff]  ;;  %vm1147_vm7 = vcmask 1046534   ;;  %vm1149_vm8 = vcmask 1047559   ;;  %vm1176_vm9 = vcmask 64512  }
  0x4f   : > { %731 = vmatpush.msra.mxu0 %v703_v5  ;;  %2992 = vmatpush.msra.mxu1 %v703_v5  ;;  %v693_v8 = vld [vmem:[#allocation2] sm:$0xff]  ;;  %v785_v44 = vld [vmem:[#allocation9 + $0x30] sm:$0xff]  ;;  %v786_v48 = vld [vmem:[#allocation9 + $0x38] sm:$0xff]  ;;  %s4748_s30 = sld [smem:[#allocation30_spill]]  ;;  %s3551_s28 = smov 32  }
  0x50   : > { %2993 = vmatpush.msra.mxu2 %v703_v5  ;;  %2994 = vmatpush.msra.mxu3 %v703_v5  ;;  %v694_v9 = vld [vmem:[#allocation2 + $0x8] sm:$0xff]  ;;  %v779_v15 = vld [vmem:[#allocation9] sm:$0xff]  ;;  %v790_v2 = vld [vmem:[#allocation9 + $0x58] sm:$0xff]  ;;  %s4749_s2 = sld [smem:[#allocation29_spill]]  ;;  %s3552_s21 = smov 96  }
  0x51   : > { %732 = vmatpush.msra.mxu0 %v702_v6  ;;  %2995 = vmatpush.msra.mxu1 %v702_v6  ;;  %v695_v10 = vld [vmem:[#allocation2 + $0x10] sm:$0xff]  ;;  %v783_v21 = vld [vmem:[#allocation9 + $0x20] sm:$0xff]  ;;  %v788_v5 = vld [vmem:[#allocation9 + $0x48] sm:$0xff]  ;;  %s4750_s17 = sld [smem:[#allocation32_spill]]  ;;  %s3553_s0 = smov [#allocation13]  }
  0x52   : > { %2996 = vmatpush.msra.mxu2 %v702_v6  ;;  %2997 = vmatpush.msra.mxu3 %v702_v6  ;;  %v696_v11 = vld [vmem:[#allocation2 + $0x18] sm:$0xff]  ;;  %v3829_v39 = vld [vmem:[%s4695_s5] ss:$0 sm:$0xff]  ;;  %s2746_s11 = sshll.u32 %s3553_s0, 4  ;;  %s4752_s25 = sld [smem:[#allocation34_spill]]  ;;  %s2747_s11 = int_to_ptr.vmem [resolvable:$true] %s2746_s11 }
  0x53   : > { %733 = vmatpush.msra.mxu0 %v701_v7  ;;  %2998 = vmatpush.msra.mxu1 %v701_v7  ;;  %s2988_s16 = sshll.u32 %s3534_s23, 5 }
  0x54   : > { %2955 = vmatmul.msk.f32.vlgmr.msra.gmra.mxu0 %vm705_vm1, %v693_v8  ;;  %2956 = vmatmul.msk.f32.vlgmr.msra.gmra.mxu1 %vm705_vm1, %v694_v9  ;;  %v789_v8 = vld [vmem:[#allocation9 + $0x50] sm:$0xff] }
  0x55   : > { %2999 = vmatpush.msra.mxu2 %v701_v7  ;;  %3000 = vmatpush.msra.mxu3 %v701_v7 }
  0x56   : > { %2957 = vmatmul.msk.f32.vlgmr.msra.gmra.mxu2 %vm705_vm1, %v695_v10  ;;  %2958 = vmatmul.msk.f32.vlgmr.msra.gmra.mxu3 %vm705_vm1, %v696_v11 }
  0x58   : > { %s2748_s29 = sshll.u32 %s4752_s25, 4  ;;  %s2749_s29 = int_to_ptr.hbm [resolvable:$true] %s2748_s29 }
  0xd1   : > { %v735_v12 = vpop.f32.mrf.mxu0  ;;  %v3823_v13 = vpop.f32.mrf.mxu1 }
  0xd2   : > { %v819_v16 = vperm.slane %v3823_v13, 0  ;;  %v811_v17 = vperm.slane %v735_v12, 0  ;;  %v752_v18 = vrot.slane %v735_v12, 2  ;;  %v754_v19 = vrot.slane %v735_v12, 4 }
  0xd3   : > { %v751_v22 = vrot.slane %v735_v12, 1  ;;  %v753_v23 = vrot.slane %v735_v12, 3  ;;  %v755_v34 = vrot.slane %v735_v12, 5  ;;  %v756_v36 = vrot.slane %v735_v12, 6 }
  0xd4   : > { %v883_v24 = vadd.f32 %v819_v16, %v787_v14  ;;  %v875_v25 = vadd.f32 %v811_v17, %v779_v15  ;;  %v813_v26 = vperm.slane %v752_v18, 0  ;;  %v815_v27 = vperm.slane %v754_v19, 0 }
  0xd5   : > { %v812_v29 = vperm.slane %v751_v22, 0  ;;  %v814_v31 = vperm.slane %v753_v23, 0  ;;  %v757_v38 = vrot.slane %v735_v12, 7  ;;  %v816_v40 = vperm.slane %v755_v34, 0 }
  0xd6   : > { %3116 = vtanh.f32 %v883_v24  ;;  %v877_v32 = vadd.f32 %v813_v26, %v781_v20  ;;  %v879_v33 = vadd.f32 %v815_v27, %v783_v21  ;;  %v817_v42 = vperm.slane %v756_v36, 0 }
  0xd7   : > { %3118 = vtanh.f32 %v875_v25  ;;  %v876_v35 = vadd.f32 %v812_v29, %v780_v28  ;;  %v878_v37 = vadd.f32 %v814_v31, %v782_v30  ;;  %v818_v45 = vperm.slane %v757_v38, 0  ;;  %v793_v25 = vld [vmem:[#allocation9 + $0x70] sm:$0xff]  ;;  %v791_v28 = vld [vmem:[#allocation9 + $0x60] sm:$0xff] }
  0xd8   : > { %3120 = vtanh.f32 %v877_v32  ;;  %v880_v51 = vadd.f32 %v816_v40, %v784_v41  ;;  %v760_v52 = vrot.slane %v3823_v13, 3  ;;  %v881_v55 = vadd.f32 %v817_v42, %v785_v44  ;;  %v792_v32 = vld [vmem:[#allocation9 + $0x68] sm:$0xff] }
  0xd9   : > { %3122 = vtanh.f32 %v879_v33  ;;  %v758_v56 = vrot.slane %v3823_v13, 1  ;;  %v882_v59 = vadd.f32 %v818_v45, %v786_v48  ;;  %v759_v60 = vrot.slane %v3823_v13, 2  ;;  %v3849_v21 = vpop.f32.mrf.mxu2  ;;  %v796_v44 = vld [vmem:[#allocation9 + $0x88] sm:$0xff]  ;;  %v795_v48 = vld [vmem:[#allocation9 + $0x80] sm:$0xff] }
  0xda   : > { %3124 = vtanh.f32 %v876_v35  ;;  %v822_v0 = vperm.slane %v760_v52, 0  ;;  %v763_v10 = vrot.slane %v3823_v13, 6  ;;  %v761_v14 = vrot.slane %v3823_v13, 4 }
  0xdb   : > { %3126 = vtanh.f32 %v878_v37  ;;  %v820_v3 = vperm.slane %v758_v56, 0  ;;  %v821_v6 = vperm.slane %v759_v60, 0  ;;  %v762_v18 = vrot.slane %v3823_v13, 5 }
  0xdc   : > { %v3117_v43 = vpop.eup %3116  ;;  %3128 = vtanh.f32 %v880_v51  ;;  %v886_v9 = vadd.f32 %v822_v0, %v790_v2  ;;  %v825_v23 = vperm.slane %v763_v10, 0  ;;  %v823_v26 = vperm.slane %v761_v14, 0  ;;  %v794_v51 = vld [vmem:[#allocation9 + $0x78] sm:$0xff]  ;;  %v799_v0 = vld [vmem:[#allocation9 + $0xa0] sm:$0xff] }
  0xdd   : > { %v3119_v46 = vpop.eup %3118  ;;  %v951_v47 = vmul.f32 %v3117_v43, %v3829_v39  ;;  %3130 = vtanh.f32 %v881_v55  ;;  %v884_v12 = vadd.f32 %v820_v3, %v788_v5  ;;  %v885_v17 = vadd.f32 %v821_v6, %v789_v8  ;;  %v803_v3 = vld [vmem:[#allocation9 + $0xc0] sm:$0xff]  ;;  %v798_v6 = vld [vmem:[#allocation9 + $0x98] sm:$0xff] }
  0xde   : > { %v3121_v49 = vpop.eup %3120  ;;  %v943_v50 = vmul.f32 %v3119_v46, %v3829_v39  ;;  %3132 = vtanh.f32 %v882_v59  ;;  %v824_v29 = vperm.slane %v762_v18, 0  ;;  %v765_v30 = vrot.slane %v3849_v21, 1 }
  0xdf   : > { %v999_v53 = vsel %vm705_vm1, %v951_v47, 0.0  ;;  %v945_v54 = vmul.f32 %v3121_v49, %v3829_v39  ;;  %v3123_v57 = vpop.eup %3122  ;;  %3134 = vtanh.f32 %v886_v9  ;;  %v889_v33 = vadd.f32 %v825_v23, %v793_v25 }
  0xe0   : > { %1000 = vadd.xlane.f32.xlu2 %v999_v53  ;;  %v975_v58 = vsel %vm705_vm1, %v943_v50, 0.0  ;;  %v3125_v61 = vpop.eup %3124  ;;  %v947_v1 = vmul.f32 %v3123_v57, %v3829_v39  ;;  %3136 = vtanh.f32 %v884_v12  ;;  %v887_v35 = vadd.f32 %v823_v26, %v791_v28  ;;  %v802_v26 = vld [vmem:[#allocation9 + $0xb8] sm:$0xff] }
  0xe1   : > { %976 = vadd.xlane.f32.xlu0 %v975_v58  ;;  %v981_v62 = vsel %vm705_vm1, %v945_v54, 0.0  ;;  %v3127_v63 = vpop.eup %3126  ;;  %v944_v4 = vmul.f32 %v3125_v61, %v3829_v39  ;;  %3138 = vtanh.f32 %v885_v17  ;;  %v764_v36 = vrot.slane %v3823_v13, 7  ;;  %v3864_v54 = vpop.f32.mrf.mxu3 }
  0xe2   : > { %982 = vadd.xlane.f32.xlu1 %v981_v62  ;;  %v946_v7 = vmul.f32 %v3127_v63, %v3829_v39  ;;  %v987_v11 = vsel %vm705_vm1, %v947_v1, 0.0  ;;  %v3129_v15 = vpop.eup %3128  ;;  %v888_v40 = vadd.f32 %v824_v29, %v792_v32  ;;  %v828_v41 = vperm.slane %v765_v30, 0  ;;  %v797_v29 = vld [vmem:[#allocation9 + $0x90] sm:$0xff] }
  0xe3   : > { %v978_v16 = vsel %vm705_vm1, %v944_v4, 0.0  ;;  %v3131_v19 = vpop.eup %3130  ;;  %v948_v24 = vmul.f32 %v3129_v15, %v3829_v39  ;;  %3140 = vtanh.f32 %v889_v33  ;;  %v827_v46 = vperm.slane %v3849_v21, 0  ;;  %v801_v32 = vld [vmem:[#allocation9 + $0xb0] sm:$0xff] }
  0xe4   : > { %v984_v20 = vsel %vm705_vm1, %v946_v7, 0.0  ;;  %v3133_v22 = vpop.eup %3132  ;;  %v949_v27 = vmul.f32 %v3131_v19, %v3829_v39  ;;  %3142 = vtanh.f32 %v887_v35  ;;  %v826_v13 = vperm.slane %v764_v36, 0 }
  0xe5   : > { %v950_v31 = vmul.f32 %v3133_v22, %v3829_v39  ;;  %v990_v34 = vsel %vm705_vm1, %v948_v24, 0.0  ;;  %v3135_v37 = vpop.eup %3134  ;;  %3144 = vtanh.f32 %v888_v40  ;;  %v892_v50 = vadd.f32 %v828_v41, %v796_v44 }
  0xe6   : > { %v993_v38 = vsel %vm705_vm1, %v949_v27, 0.0  ;;  %v3137_v42 = vpop.eup %3136  ;;  %v954_v47 = vmul.f32 %v3135_v37, %v3829_v39  ;;  %v768_v52 = vrot.slane %v3849_v21, 4  ;;  %v891_v55 = vadd.f32 %v827_v46, %v795_v48  ;;  %v805_v48 = vld [vmem:[#allocation9 + $0xd0] sm:$0xff] }
  0xe7   : > { %v996_v43 = vsel %vm705_vm1, %v950_v31, 0.0  ;;  %v3139_v45 = vpop.eup %3138  ;;  %v952_v49 = vmul.f32 %v3137_v42, %v3829_v39  ;;  %v767_v56 = vrot.slane %v3849_v21, 3  ;;  %v890_v58 = vadd.f32 %v826_v13, %v794_v51 }
  0xe8   : > { %988 = vadd.xlane.f32.xlu2 %v987_v11  ;;  %v953_v53 = vmul.f32 %v3139_v45, %v3829_v39  ;;  %v1008_v57 = vsel %vm705_vm1, %v954_v47, 0.0  ;;  %3146 = vtanh.f32 %v892_v50  ;;  %v831_v61 = vperm.slane %v768_v52, 0  ;;  %v804_v52 = vld [vmem:[#allocation9 + $0xc8] sm:$0xff] }
  0xe9   : > { %979 = vadd.xlane.f32.xlu0 %v978_v16  ;;  %v3141_v59 = vpop.eup %3140  ;;  %v1002_v60 = vsel %vm705_vm1, %v952_v49, 0.0  ;;  %v835_v1 = vperm.slane %v3864_v54, 0  ;;  %3148 = vtanh.f32 %v891_v55  ;;  %v830_v4 = vperm.slane %v767_v56, 0  ;;  %v800_v49 = vld [vmem:[#allocation9 + $0xa8] sm:$0xff] }
  0xea   : > { %985 = vadd.xlane.f32.xlu1 %v984_v20  ;;  %v3143_v62 = vpop.eup %3142  ;;  %v1005_v63 = vsel %vm705_vm1, %v953_v53, 0.0  ;;  %v957_v5 = vmul.f32 %v3141_v59, %v3829_v39  ;;  %3150 = vtanh.f32 %v890_v58  ;;  %v895_v8 = vadd.f32 %v831_v61, %v799_v0 }
  0xeb   : > { %v3145_v2 = vpop.eup %3144  ;;  %v955_v7 = vmul.f32 %v3143_v62, %v3829_v39  ;;  %v899_v10 = vadd.f32 %v835_v1, %v803_v3  ;;  %v894_v12 = vadd.f32 %v830_v4, %v798_v6  ;;  %v771_v14 = vrot.slane %v3849_v21, 7  ;;  %v808_v3 = vld [vmem:[#allocation9 + $0xe8] sm:$0xff]  ;;  %v806_v6 = vld [vmem:[#allocation9 + $0xd8] sm:$0xff] }
  0xec   : > { %v956_v9 = vmul.f32 %v3145_v2, %v3829_v39  ;;  %v1017_v15 = vsel %vm705_vm1, %v957_v5, 0.0  ;;  %v766_v16 = vrot.slane %v3849_v21, 2  ;;  %3152 = vtanh.f32 %v895_v8 }
  0xed   : > { %v1011_v18 = vsel %vm705_vm1, %v955_v7, 0.0  ;;  %v770_v19 = vrot.slane %v3849_v21, 6  ;;  %3154 = vtanh.f32 %v899_v10  ;;  %v834_v24 = vperm.slane %v771_v14, 0 }
  0xee   : > { %v3147_v11 = vpop.eup %3146  ;;  %v1014_v22 = vsel %vm705_vm1, %v956_v9, 0.0  ;;  %3156 = vtanh.f32 %v894_v12  ;;  %v829_v27 = vperm.slane %v766_v16, 0  ;;  %v773_v35 = vrot.slane %v3864_v54, 2  ;;  %v807_v9 = vld [vmem:[#allocation9 + $0xe0] sm:$0xff] }
  0xef   : > { %v3149_v17 = vpop.eup %3148  ;;  %v960_v23 = vmul.f32 %v3147_v11, %v3829_v39  ;;  %v833_v30 = vperm.slane %v770_v19, 0  ;;  %v769_v40 = vrot.slane %v3849_v21, 5  ;;  %v772_v44 = vrot.slane %v3864_v54, 1 }
  0xf0   : > { %991 = vadd.xlane.f32.xlu2 %v990_v34  ;;  %v3151_v20 = vpop.eup %3150  ;;  %v959_v25 = vmul.f32 %v3149_v17, %v3829_v39  ;;  %v898_v34 = vadd.f32 %v834_v24, %v802_v26  ;;  %v837_v47 = vperm.slane %v773_v35, 0  ;;  %v776_v56 = vrot.slane %v3864_v54, 5  ;;  %v809_v26 = vld [vmem:[#allocation9 + $0xf0] sm:$0xff] }
  0xf1   : > { %994 = vadd.xlane.f32.xlu0 %v993_v38  ;;  %v958_v28 = vmul.f32 %v3151_v20, %v3829_v39  ;;  %v1026_v31 = vsel %vm705_vm1, %v960_v23, 0.0  ;;  %v893_v38 = vadd.f32 %v829_v27, %v797_v29  ;;  %v832_v21 = vperm.slane %v769_v40, 0  ;;  %v810_v29 = vld [vmem:[#allocation9 + $0xf8] sm:$0xff] }
  0xf2   : > { %997 = vadd.xlane.f32.xlu1 %v996_v43  ;;  %v3153_v33 = vpop.eup %3152  ;;  %v1023_v37 = vsel %vm705_vm1, %v959_v25, 0.0  ;;  %v897_v43 = vadd.f32 %v833_v30, %v801_v32  ;;  %3158 = vtanh.f32 %v898_v34  ;;  %v836_v50 = vperm.slane %v772_v44, 0 }
  0xf3   : > { %v3155_v36 = vpop.eup %3154  ;;  %v1020_v42 = vsel %vm705_vm1, %v958_v28, 0.0  ;;  %v963_v45 = vmul.f32 %v3153_v33, %v3829_v39  ;;  %3160 = vtanh.f32 %v893_v38  ;;  %v901_v55 = vadd.f32 %v837_v47, %v805_v48 }
  0xf4   : > { %v3157_v41 = vpop.eup %3156  ;;  %v967_v46 = vmul.f32 %v3155_v36, %v3829_v39  ;;  %3162 = vtanh.f32 %v897_v43  ;;  %v896_v58 = vadd.f32 %v832_v21, %v800_v49  ;;  %v774_v59 = vrot.slane %v3864_v54, 3 }
  0xf5   : > { %v962_v13 = vmul.f32 %v3157_v41, %v3829_v39  ;;  %v1035_v51 = vsel %vm705_vm1, %v963_v45, 0.0  ;;  %v900_v61 = vadd.f32 %v836_v50, %v804_v52  ;;  %v775_v62 = vrot.slane %v3864_v54, 4 }
  0xf6   : > { %v1047_v53 = vsel %vm705_vm1, %v967_v46, 0.0  ;;  %3164 = vtanh.f32 %v901_v55  ;;  %v840_v1 = vperm.slane %v776_v56, 0  ;;  %v838_v4 = vperm.slane %v774_v59, 0 }
  0xf7   : > { %3166 = vtanh.f32 %v896_v58  ;;  %v839_v7 = vperm.slane %v775_v62, 0  ;;  %v777_v14 = vrot.slane %v3864_v54, 6  ;;  %v1103_v50 = vlaneseq }
  0xf8   : > { %1009 = vadd.xlane.f32.xlu2 %v1008_v57  ;;  %v1032_v57 = vsel %vm705_vm1, %v962_v13, 0.0  ;;  %3168 = vtanh.f32 %v900_v61  ;;  %v904_v10 = vadd.f32 %v840_v1, %v808_v3  ;;  %v902_v12 = vadd.f32 %v838_v4, %v806_v6 }
  0xf9   : > { %1003 = vadd.xlane.f32.xlu0 %v1002_v60  ;;  %v3159_v60 = vpop.eup %3158  ;;  %v903_v17 = vadd.f32 %v839_v7, %v807_v9  ;;  %v841_v24 = vperm.slane %v777_v14, 0  ;;  %v3928_v52 = vand.u32 127, %v1103_v50 }
  0xfa   : > { %1006 = vadd.xlane.f32.xlu1 %v1005_v63  ;;  %v3161_v63 = vpop.eup %3160  ;;  %v966_v2 = vmul.f32 %v3159_v60, %v3829_v39  ;;  %3170 = vtanh.f32 %v904_v10 }
  0xfb   : > { %v3163_v0 = vpop.eup %3162  ;;  %v961_v5 = vmul.f32 %v3161_v63, %v3829_v39  ;;  %3172 = vtanh.f32 %v902_v12  ;;  %v905_v30 = vadd.f32 %v841_v24, %v809_v26 }
  0xfc   : > { %v965_v8 = vmul.f32 %v3163_v0, %v3829_v39  ;;  %v1044_v11 = vsel %vm705_vm1, %v966_v2, 0.0  ;;  %3174 = vtanh.f32 %v903_v17 }
  0xfd   : > { %v1029_v16 = vsel %vm705_vm1, %v961_v5, 0.0  ;;  %3176 = vtanh.f32 %v905_v30 }
  0xfe   : > { %v1041_v20 = vsel %vm705_vm1, %v965_v8, 0.0 }
 0x100   : > { %1018 = vadd.xlane.f32.xlu2 %v1017_v15  ;;  %v3165_v15 = vpop.eup %3164 }
 0x101   : > { %1012 = vadd.xlane.f32.xlu0 %v1011_v18  ;;  %v778_v18 = vrot.slane %v3864_v54, 7  ;;  %v3167_v19 = vpop.eup %3166  ;;  %v969_v23 = vmul.f32 %v3165_v15, %v3829_v39 }
 0x102   : > { %1015 = vadd.xlane.f32.xlu1 %v1014_v22  ;;  %v3169_v22 = vpop.eup %3168  ;;  %v964_v25 = vmul.f32 %v3167_v19, %v3829_v39 }
 0x103   : > { %v842_v27 = vperm.slane %v778_v18, 0  ;;  %v968_v28 = vmul.f32 %v3169_v22, %v3829_v39  ;;  %v1053_v54 = vsel %vm705_vm1, %v969_v23, 0.0 }
 0x104   : > { %v1038_v32 = vsel %vm705_vm1, %v964_v25, 0.0 }
 0x105   : > { %v906_v33 = vadd.f32 %v842_v27, %v810_v29  ;;  %v1050_v35 = vsel %vm705_vm1, %v968_v28, 0.0 }
 0x107   : > { %3178 = vtanh.f32 %v906_v33 }
 0x108   : > { %1027 = vadd.xlane.f32.xlu2 %v1026_v31  ;;  %v3171_v31 = vpop.eup %3170 }
 0x109   : > { %1021 = vadd.xlane.f32.xlu0 %v1020_v42  ;;  %v3173_v34 = vpop.eup %3172 }
 0x10a   : > { %1024 = vadd.xlane.f32.xlu1 %v1023_v37  ;;  %v3175_v36 = vpop.eup %3174  ;;  %v972_v37 = vmul.f32 %v3171_v31, %v3829_v39  ;;  %v970_v38 = vmul.f32 %v3173_v34, %v3829_v39 }
 0x10b   : > { %v971_v40 = vmul.f32 %v3175_v36, %v3829_v39  ;;  %v3177_v43 = vpop.eup %3176 }
 0x10c   : > { %v1062_v41 = vsel %vm705_vm1, %v972_v37, 0.0  ;;  %v1056_v42 = vsel %vm705_vm1, %v970_v38, 0.0  ;;  %v973_v46 = vmul.f32 %v3177_v43, %v3829_v39 }
 0x10d   : > { %v1059_v44 = vsel %vm705_vm1, %v971_v40, 0.0  ;;  %v3179_v45 = vpop.eup %3178 }
 0x10e   : > { %v974_v47 = vmul.f32 %v3179_v45, %v3829_v39  ;;  %v1065_v13 = vsel %vm705_vm1, %v973_v46, 0.0 }
 0x110   : > { %1036 = vadd.xlane.f32.xlu2 %v1035_v51  ;;  %v1068_v48 = vsel %vm705_vm1, %v974_v47, 0.0 }
 0x111   : > { %1048 = vadd.xlane.f32.xlu0 %v1047_v53 }
 0x112   : > { %1033 = vadd.xlane.f32.xlu1 %v1032_v57 }
 0x118   : > { %1045 = vadd.xlane.f32.xlu2 %v1044_v11 }
 0x119   : > { %1030 = vadd.xlane.f32.xlu0 %v1029_v16 }
 0x11a   : > { %1042 = vadd.xlane.f32.xlu1 %v1041_v20 }
 0x120   : > { %1054 = vadd.xlane.f32.xlu2 %v1053_v54 }
 0x121   : > { %1039 = vadd.xlane.f32.xlu0 %v1038_v32 }
 0x122   : > { %1051 = vadd.xlane.f32.xlu1 %v1050_v35 }
 0x128   : > { %1063 = vadd.xlane.f32.xlu2 %v1062_v41 }
 0x129   : > { %1057 = vadd.xlane.f32.xlu0 %v1056_v42 }
 0x12a   : > { %1060 = vadd.xlane.f32.xlu1 %v1059_v44 }
 0x131   : > { %1066 = vadd.xlane.f32.xlu0 %v1065_v13 }
 0x132   : > { %1069 = vadd.xlane.f32.xlu1 %v1068_v48 }
 0x153   : > { %v3922_v21 = vpop.xlane.xlu2 %1000 }
 0x154   : > { %v3924_v49 = vpop.xlane.xlu0 %976  ;;  %v1113_v16 = vperm.slane %v3922_v21, %v3928_v52 }
 0x155   : > { %v3926_v51 = vpop.xlane.xlu1 %982  ;;  %v1105_v39 = vperm.slane %v3924_v49, %v3928_v52 }
 0x156   : > { %v1107_v58 = vperm.slane %v3926_v51, %v3928_v52 }
 0x15b   : > { %v3930_v53 = vpop.xlane.xlu2 %988 }
 0x15c   : > { %v3932_v55 = vpop.xlane.xlu0 %979  ;;  %v1109_v63 = vperm.slane %v3930_v53, %v3928_v52 }
 0x15d   : > { %v1106_v56 = vperm.slane %v3932_v55, %v3928_v52  ;;  %v3938_v57 = vpop.xlane.xlu1 %985 }
 0x15e   : > { %v1108_v59 = vperm.slane %v3938_v57, %v3928_v52 }
 0x15f   : > { %v1138_v60 = vsel %vm1137_vm2, %v1106_v56, %v1105_v39 }
 0x160   : > { %v1140_v61 = vsel %vm1139_vm3, %v1107_v58, %v1138_v60 }
 0x161   : > { %v1142_v62 = vsel %vm1141_vm4, %v1108_v59, %v1140_v61 }
 0x162   : > { %v1144_v5 = vsel %vm1143_vm5, %v1109_v63, %v1142_v62 }
 0x163   : > { %v3949_v0 = vpop.xlane.xlu2 %991 }
 0x164   : > { %v1110_v1 = vperm.slane %v3949_v0, %v3928_v52  ;;  %v3953_v2 = vpop.xlane.xlu0 %994 }
 0x165   : > { %v1111_v3 = vperm.slane %v3953_v2, %v3928_v52  ;;  %v3957_v4 = vpop.xlane.xlu1 %997 }
 0x166   : > { %v1112_v6 = vperm.slane %v3957_v4, %v3928_v52  ;;  %v1146_v7 = vsel %vm1145_vm6, %v1110_v1, %v1144_v5 }
 0x167   : > { %v1148_v8 = vsel %vm1147_vm7, %v1111_v3, %v1146_v7 }
 0x168   : > { %v1150_v9 = vsel %vm1149_vm8, %v1112_v6, %v1148_v8 }
 0x169   : > { %v1177_v10 = vsel %vm1176_vm9, %v1150_v9, -inf }
 0x16a   : > { %1178 = vmax.xlane.f32.xlu2 %v1177_v10 }
 0x16b   : > { %v3966_v11 = vpop.xlane.xlu2 %1009 }
 0x16c   : > { %v3968_v12 = vpop.xlane.xlu0 %1003  ;;  %v1116_v23 = vperm.slane %v3966_v11, %v3928_v52 }
 0x16d   : > { %v1114_v14 = vperm.slane %v3968_v12, %v3928_v52  ;;  %v3972_v15 = vpop.xlane.xlu1 %1006 }
 0x16e   : > { %v1115_v17 = vperm.slane %v3972_v15, %v3928_v52 }
 0x16f   : > { %v1151_v18 = vsel %vm1137_vm2, %v1114_v14, %v1113_v16 }
 0x170   : > { %v1152_v20 = vsel %vm1139_vm3, %v1115_v17, %v1151_v18 }
 0x171   : > { %v1153_v26 = vsel %vm1141_vm4, %v1116_v23, %v1152_v20 }
 0x173   : > { %v3979_v19 = vpop.xlane.xlu2 %1018 }
 0x174   : > { %v3982_v22 = vpop.xlane.xlu0 %1012  ;;  %v1119_v30 = vperm.slane %v3979_v19, %v3928_v52 }
 0x175   : > { %v1117_v24 = vperm.slane %v3982_v22, %v3928_v52  ;;  %v3988_v25 = vpop.xlane.xlu1 %1015 }
 0x176   : > { %v1118_v27 = vperm.slane %v3988_v25, %v3928_v52 }
 0x177   : > { %v1154_v28 = vsel %vm1143_vm5, %v1117_v24, %v1153_v26 }
 0x178   : > { %v1155_v54 = vsel %vm1145_vm6, %v1118_v27, %v1154_v28 }
 0x179   : > { %v1156_v34 = vsel %vm1147_vm7, %v1119_v30, %v1155_v54 }
 0x17b   : > { %v3994_v29 = vpop.xlane.xlu2 %1027 }
 0x17c   : > { %v3999_v31 = vpop.xlane.xlu0 %1021  ;;  %v1122_v41 = vperm.slane %v3994_v29, %v3928_v52 }
 0x17d   : > { %v1120_v32 = vperm.slane %v3999_v31, %v3928_v52  ;;  %v4003_v33 = vpop.xlane.xlu1 %1024 }
 0x17e   : > { %v1121_v42 = vperm.slane %v4003_v33, %v3928_v52 }
 0x17f   : > { %v1157_v35 = vsel %vm1149_vm8, %v1120_v32, %v1156_v34 }
 0x180   : > { %v1180_v36 = vsel %vm1176_vm9, %v1157_v35, -inf  ;;  %v1158_v47 = vsel %vm1137_vm2, %v1122_v41, %v1121_v42  ;;  %v3549_v42 = vmov 0  }
 0x181   : > { %1181 = vmax.xlane.f32.xlu0 %v1180_v36  ;;  %3111 = vset.pattern.permute.xlu2 %v3549_v42 }
 0x182   : > { %3110 = vset.pattern.permute.xlu1 %v3549_v42  ;;  %3109 = vset.pattern.permute.xlu0 %v3549_v42 }
 0x183   : > { %v4008_v37 = vpop.xlane.xlu2 %1036 }
 0x184   : > { %v4010_v38 = vpop.xlane.xlu0 %1048  ;;  %v1125_v39 = vperm.slane %v4008_v37, %v3928_v52 }
 0x185   : > { %v4012_v40 = vpop.xlane.xlu1 %1033  ;;  %v1129_v7 = vperm.slane %v4010_v38, %v3928_v52 }
 0x186   : > { %v1124_v48 = vperm.slane %v4012_v40, %v3928_v52 }
 0x18b   : > { %v4020_v44 = vpop.xlane.xlu2 %1045 }
 0x18c   : > { %v4018_v43 = vpop.xlane.xlu0 %1030  ;;  %v1128_v62 = vperm.slane %v4020_v44, %v3928_v52 }
 0x18d   : > { %v1123_v45 = vperm.slane %v4018_v43, %v3928_v52  ;;  %v4024_v46 = vpop.xlane.xlu1 %1042 }
 0x18e   : > { %v1127_v60 = vperm.slane %v4024_v46, %v3928_v52 }
 0x18f   : > { %v1159_v13 = vsel %vm1139_vm3, %v1123_v45, %v1158_v47 }
 0x190   : > { %v1160_v50 = vsel %vm1141_vm4, %v1124_v48, %v1159_v13 }
 0x191   : > { %v1161_v61 = vsel %vm1143_vm5, %v1125_v39, %v1160_v50 }
 0x193   : > { %v4044_v63 = vpop.xlane.xlu2 %1054 }
 0x194   : > { %v4033_v56 = vpop.xlane.xlu0 %1039  ;;  %v1131_v14 = vperm.slane %v4044_v63, %v3928_v52 }
 0x195   : > { %v1126_v58 = vperm.slane %v4033_v56, %v3928_v52  ;;  %v4037_v59 = vpop.xlane.xlu1 %1051 }
 0x196   : > { %v1130_v3 = vperm.slane %v4037_v59, %v3928_v52 }
 0x197   : > { %v1162_v1 = vsel %vm1145_vm6, %v1126_v58, %v1161_v61 }
 0x198   : > { %v1163_v5 = vsel %vm1147_vm7, %v1127_v60, %v1162_v1  ;;  %v1165_v9 = vsel %vm1137_vm2, %v1130_v3, %v1129_v7 }
 0x199   : > { %v1164_v6 = vsel %vm1149_vm8, %v1128_v62, %v1163_v5  ;;  %v1166_v18 = vsel %vm1139_vm3, %v1131_v14, %v1165_v9 }
 0x19a   : > { %v1183_v8 = vsel %vm1176_vm9, %v1164_v6, -inf }
 0x19b   : > { %1184 = vmax.xlane.f32.xlu1 %v1183_v8  ;;  %v4067_v24 = vpop.xlane.xlu2 %1063 }
 0x19c   : > { %v4055_v10 = vpop.xlane.xlu0 %1057  ;;  %v1134_v27 = vperm.slane %v4067_v24, %v3928_v52 }
 0x19d   : > { %v1132_v16 = vperm.slane %v4055_v10, %v3928_v52  ;;  %v4061_v17 = vpop.xlane.xlu1 %1060 }
 0x19e   : > { %v1133_v20 = vperm.slane %v4061_v17, %v3928_v52 }
 0x19f   : > { %v1167_v23 = vsel %vm1141_vm4, %v1132_v16, %v1166_v18 }
 0x1a0   : > { %v1168_v26 = vsel %vm1143_vm5, %v1133_v20, %v1167_v23 }
 0x1a1   : > { %v1169_v34 = vsel %vm1145_vm6, %v1134_v27, %v1168_v26 }
 0x1a4   : > { %v4072_v28 = vpop.xlane.xlu0 %1066 }
 0x1a5   : > { %v1135_v54 = vperm.slane %v4072_v28, %v3928_v52  ;;  %v4076_v30 = vpop.xlane.xlu1 %1069 }
 0x1a6   : > { %v1136_v32 = vperm.slane %v4076_v30, %v3928_v52 }
 0x1a7   : > { %v1170_v35 = vsel %vm1147_vm7, %v1135_v54, %v1169_v34 }
 0x1a8   : > { %v1171_v36 = vsel %vm1149_vm8, %v1136_v32, %v1170_v35 }
 0x1a9   : > { %v1186_v41 = vsel %vm1176_vm9, %v1171_v36, -inf }
 0x1aa   : > { %1187 = vmax.xlane.f32.xlu2 %v1186_v41 }
 0x1dd   : > { %v1179_v45 = vpop.xlane.xlu2 %1178 }
 0x1de   : > { %v1193_v47 = vperm.slane %v1179_v45, 0  ;;  %v1194_v13 = vperm.slane %v1179_v45, 1  ;;  %v1195_v48 = vperm.slane %v1179_v45, 2  ;;  %v1200_v60 = vperm.slane %v1179_v45, 7 }
 0x1df   : > { %v1197_v61 = vperm.slane %v1179_v45, 4  ;;  %v1196_v62 = vperm.slane %v1179_v45, 3  ;;  %v1198_v16 = vperm.slane %v1179_v45, 5 }
 0x1e0   : > { %v1257_v50 = vsub.f32 %v3924_v49, %v1193_v47  ;;  %v1258_v39 = vsub.f32 %v3932_v55, %v1194_v13  ;;  %v1259_v58 = vsub.f32 %v3926_v51, %v1195_v48  ;;  %v1264_v6 = vsub.f32 %v3957_v4, %v1200_v60 }
 0x1e1   : > { %v1261_v7 = vsub.f32 %v3930_v53, %v1197_v61  ;;  %v1260_v8 = vsub.f32 %v3938_v57, %v1196_v62  ;;  %v1199_v55 = vperm.slane %v1179_v45, 6  ;;  %v1262_v57 = vsub.f32 %v3949_v0, %v1198_v16 }
 0x1e2   : > { %v1289_v1 = vmul.f32 1.442695, %v1257_v50  ;;  %v1291_v3 = vmul.f32 1.442695, %v1258_v39  ;;  %v1293_v5 = vmul.f32 1.442695, %v1259_v58 }
 0x1e3   : > { %v1303_v49 = vmul.f32 1.442695, %v1264_v6  ;;  %v1297_v9 = vmul.f32 1.442695, %v1261_v7  ;;  %v1295_v51 = vmul.f32 1.442695, %v1260_v8  ;;  %v1263_v53 = vsub.f32 %v3953_v2, %v1199_v55 }
 0x1e4   : > { %3180 = vpow2.f32 %v1289_v1  ;;  %v1299_v26 = vmul.f32 1.442695, %v1262_v57 }
 0x1e5   : > { %3182 = vpow2.f32 %v1291_v3  ;;  %v1301_v4 = vmul.f32 1.442695, %v1263_v53 }
 0x1e6   : > { %3184 = vpow2.f32 %v1293_v5 }
 0x1e7   : > { %3186 = vpow2.f32 %v1303_v49 }
 0x1e8   : > { %3188 = vpow2.f32 %v1297_v9 }
 0x1e9   : > { %3190 = vpow2.f32 %v1295_v51 }
 0x1ea   : > { %v4090_v14 = vpop.eup %3180  ;;  %3192 = vpow2.f32 %v1301_v4 }
 0x1eb   : > { %v4092_v18 = vpop.eup %3182  ;;  %1386 = vperm.xlu0 %3109, %v4090_v14   ;;  %3194 = vpow2.f32 %v1299_v26 }
 0x1ec   : > { %v4095_v20 = vpop.eup %3184  ;;  %1389 = vperm.xlu1 %3110, %v4092_v18  }
 0x1ed   : > { %1392 = vperm.xlu2 %3111, %v4095_v20   ;;  %v4101_v23 = vpop.eup %3186 }
 0x1ee   : > { %v4103_v27 = vpop.eup %3188 }
 0x1ef   : > { %v4106_v54 = vpop.eup %3190 }
 0x1f0   : > { %v4113_v39 = vpop.eup %3192 }
 0x1f1   : > { %v4116_v60 = vpop.eup %3194 }
 0x1f3   : > { %1407 = vperm.xlu0 %3109, %v4101_v23  }
 0x1f4   : > { %1398 = vperm.xlu1 %3110, %v4103_v27   ;;  %v1182_v32 = vpop.xlane.xlu0 %1181 }
 0x1f5   : > { %1395 = vperm.xlu2 %3111, %v4106_v54   ;;  %v1203_v2 = vperm.slane %v1182_v32, 2  ;;  %v1202_v34 = vperm.slane %v1182_v32, 1  ;;  %v1201_v35 = vperm.slane %v1182_v32, 0  ;;  %v1206_v42 = vperm.slane %v1182_v32, 5 }
 0x1f6   : > { %v1205_v13 = vperm.slane %v1182_v32, 4  ;;  %v1204_v50 = vperm.slane %v1182_v32, 3  ;;  %v1208_v1 = vperm.slane %v1182_v32, 7  ;;  %v1207_v3 = vperm.slane %v1182_v32, 6 }
 0x1f7   : > { %v1267_v0 = vsub.f32 %v3972_v15, %v1203_v2  ;;  %v1266_v36 = vsub.f32 %v3968_v12, %v1202_v34  ;;  %v1265_v41 = vsub.f32 %v3922_v21, %v1201_v35  ;;  %v1270_v58 = vsub.f32 %v3988_v25, %v1206_v42 }
 0x1f8   : > { %v1269_v21 = vsub.f32 %v3982_v22, %v1205_v13  ;;  %v1268_v12 = vsub.f32 %v3966_v11, %v1204_v50  ;;  %v1272_v11 = vsub.f32 %v3999_v31, %v1208_v1  ;;  %v1271_v22 = vsub.f32 %v3979_v19, %v1207_v3 }
 0x1f9   : > { %v1309_v45 = vmul.f32 1.442695, %v1267_v0  ;;  %v1307_v47 = vmul.f32 1.442695, %v1266_v36  ;;  %v1305_v48 = vmul.f32 1.442695, %v1265_v41 }
 0x1fa   : > { %v1315_v15 = vmul.f32 1.442695, %v1270_v58  ;;  %v1313_v62 = vmul.f32 1.442695, %v1269_v21  ;;  %v1311_v25 = vmul.f32 1.442695, %v1268_v12 }
 0x1fb   : > { %3196 = vpow2.f32 %v1309_v45  ;;  %v1319_v8 = vmul.f32 1.442695, %v1272_v11  ;;  %v1317_v49 = vmul.f32 1.442695, %v1271_v22 }
 0x1fc   : > { %1404 = vperm.xlu1 %3110, %v4113_v39   ;;  %3198 = vpow2.f32 %v1307_v47 }
 0x1fd   : > { %1401 = vperm.xlu2 %3111, %v4116_v60   ;;  %3200 = vpow2.f32 %v1305_v48 }
 0x1fe   : > { %3202 = vpow2.f32 %v1315_v15 }
 0x1ff   : > { %3204 = vpow2.f32 %v1313_v62 }
 0x200   : > { %3206 = vpow2.f32 %v1311_v25 }
 0x201   : > { %v4122_v61 = vpop.eup %3196  ;;  %3208 = vpow2.f32 %v1319_v8 }
 0x202   : > { %1416 = vperm.xlu0 %3109, %v4122_v61   ;;  %v4125_v5 = vpop.eup %3198  ;;  %3210 = vpow2.f32 %v1317_v49 }
 0x203   : > { %v4127_v6 = vpop.eup %3200 }
 0x204   : > { %1413 = vperm.xlu1 %3110, %v4125_v5   ;;  %v4133_v7 = vpop.eup %3202 }
 0x205   : > { %1410 = vperm.xlu2 %3111, %v4127_v6   ;;  %v4136_v9 = vpop.eup %3204 }
 0x206   : > { %v4138_v55 = vpop.eup %3206 }
 0x207   : > { %v4145_v34 = vpop.eup %3208 }
 0x208   : > { %v4147_v41 = vpop.eup %3210 }
 0x20a   : > { %1425 = vperm.xlu0 %3109, %v4133_v7  }
 0x20c   : > { %1422 = vperm.xlu1 %3110, %v4136_v9  }
 0x20d   : > { %1419 = vperm.xlu2 %3111, %v4138_v55  }
 0x20e   : > { %v1185_v51 = vpop.xlane.xlu1 %1184 }
 0x20f   : > { %v1209_v31 = vperm.slane %v1185_v51, 0  ;;  %v1211_v16 = vperm.slane %v1185_v51, 2  ;;  %v1210_v19 = vperm.slane %v1185_v51, 1  ;;  %v1212_v26 = vperm.slane %v1185_v51, 3 }
 0x210   : > { %v1214_v32 = vperm.slane %v1185_v51, 5  ;;  %v1213_v2 = vperm.slane %v1185_v51, 4  ;;  %v1215_v45 = vperm.slane %v1185_v51, 6  ;;  %v1216_v50 = vperm.slane %v1185_v51, 7 }
 0x211   : > { %v1273_v53 = vsub.f32 %v4003_v33, %v1209_v31  ;;  %v1275_v57 = vsub.f32 %v4018_v43, %v1211_v16  ;;  %v1274_v4 = vsub.f32 %v3994_v29, %v1210_v19  ;;  %v1276_v33 = vsub.f32 %v4012_v40, %v1212_v26 }
 0x212   : > { %v1278_v29 = vsub.f32 %v4033_v56, %v1214_v32  ;;  %v1277_v43 = vsub.f32 %v4008_v37, %v1213_v2  ;;  %v1279_v56 = vsub.f32 %v4024_v46, %v1215_v45  ;;  %v1280_v12 = vsub.f32 %v4020_v44, %v1216_v50 }
 0x213   : > { %v1321_v35 = vmul.f32 1.442695, %v1273_v53  ;;  %v1325_v0 = vmul.f32 1.442695, %v1275_v57  ;;  %v1323_v36 = vmul.f32 1.442695, %v1274_v4 }
 0x214   : > { %1431 = vperm.xlu1 %3110, %v4145_v34   ;;  %v1327_v42 = vmul.f32 1.442695, %v1276_v33  ;;  %v1331_v47 = vmul.f32 1.442695, %v1278_v29  ;;  %v1329_v48 = vmul.f32 1.442695, %v1277_v43 }
 0x215   : > { %1428 = vperm.xlu2 %3111, %v4147_v41   ;;  %3212 = vpow2.f32 %v1321_v35  ;;  %v1333_v62 = vmul.f32 1.442695, %v1279_v56  ;;  %v1335_v22 = vmul.f32 1.442695, %v1280_v12 }
 0x216   : > { %3214 = vpow2.f32 %v1325_v0 }
 0x217   : > { %3216 = vpow2.f32 %v1323_v36 }
 0x218   : > { %3218 = vpow2.f32 %v1327_v42 }
 0x219   : > { %3220 = vpow2.f32 %v1331_v47 }
 0x21a   : > { %3222 = vpow2.f32 %v1329_v48 }
 0x21b   : > { %v4154_v13 = vpop.eup %3212 }
 0x21c   : > { %v4156_v58 = vpop.eup %3214  ;;  %1434 = vperm.xlu0 %3109, %v4154_v13  }
 0x21d   : > { %v4159_v21 = vpop.eup %3216  ;;  %1440 = vperm.xlu1 %3110, %v4156_v58   ;;  %v1188_v40 = vpop.xlane.xlu2 %1187 }
 0x21e   : > { %1437 = vperm.xlu2 %3111, %v4159_v21   ;;  %v1217_v37 = vperm.slane %v1188_v40, 0  ;;  %v1218_v1 = vperm.slane %v1188_v40, 1  ;;  %v1220_v3 = vperm.slane %v1188_v40, 3  ;;  %v4166_v11 = vpop.eup %3218  ;;  %v1219_v8 = vperm.slane %v1188_v40, 2 }
 0x21f   : > { %v4168_v49 = vpop.eup %3220  ;;  %v1221_v16 = vperm.slane %v1188_v40, 4  ;;  %v1223_v57 = vperm.slane %v1188_v40, 6  ;;  %v1222_v32 = vperm.slane %v1188_v40, 5  ;;  %v1224_v0 = vperm.slane %v1188_v40, 7 }
 0x220   : > { %v1281_v15 = vsub.f32 %v4010_v38, %v1217_v37  ;;  %v4171_v46 = vpop.eup %3222  ;;  %v1282_v38 = vsub.f32 %v4037_v59, %v1218_v1  ;;  %v1284_v44 = vsub.f32 %v4055_v10, %v1220_v3  ;;  %v1283_v51 = vsub.f32 %v4044_v63, %v1219_v8 }
 0x221   : > { %v1285_v10 = vsub.f32 %v4061_v17, %v1221_v16  ;;  %v1287_v63 = vsub.f32 %v4072_v28, %v1223_v57  ;;  %v1286_v2 = vsub.f32 %v4067_v24, %v1222_v32  ;;  %v1288_v17 = vsub.f32 %v4076_v30, %v1224_v0 }
 0x222   : > { %v1337_v25 = vmul.f32 1.442695, %v1281_v15  ;;  %v1339_v31 = vmul.f32 1.442695, %v1282_v38  ;;  %v1343_v53 = vmul.f32 1.442695, %v1284_v44 }
 0x223   : > { %v1341_v26 = vmul.f32 1.442695, %v1283_v51  ;;  %v1345_v35 = vmul.f32 1.442695, %v1285_v10  ;;  %v1349_v36 = vmul.f32 1.442695, %v1287_v63 }
 0x224   : > { %1443 = vperm.xlu0 %3109, %v4166_v11   ;;  %3224 = vpow2.f32 %v1337_v25  ;;  %v1347_v29 = vmul.f32 1.442695, %v1286_v2  ;;  %v1351_v24 = vmul.f32 1.442695, %v1288_v17 }
 0x225   : > { %1449 = vperm.xlu1 %3110, %v4168_v49   ;;  %3226 = vpow2.f32 %v1333_v62 }
 0x226   : > { %1446 = vperm.xlu2 %3111, %v4171_v46   ;;  %3228 = vpow2.f32 %v1335_v22 }
 0x227   : > { %3230 = vpow2.f32 %v1339_v31 }
 0x228   : > { %3232 = vpow2.f32 %v1343_v53 }
 0x229   : > { %3234 = vpow2.f32 %v1341_v26 }
 0x22a   : > { %v4178_v19 = vpop.eup %3224  ;;  %3236 = vpow2.f32 %v1345_v35 }
 0x22b   : > { %v4180_v4 = vpop.eup %3226  ;;  %3238 = vpow2.f32 %v1349_v36 }
 0x22c   : > { %1452 = vperm.xlu0 %3109, %v4180_v4   ;;  %v4183_v59 = vpop.eup %3228  ;;  %3240 = vpow2.f32 %v1347_v29 }
 0x22d   : > { %1458 = vperm.xlu1 %3110, %v4178_v19   ;;  %v4190_v33 = vpop.eup %3230  ;;  %3242 = vpow2.f32 %v1351_v24 }
 0x22e   : > { %1455 = vperm.xlu2 %3111, %v4183_v59   ;;  %v4192_v43 = vpop.eup %3232 }
 0x22f   : > { %v4195_v42 = vpop.eup %3234 }
 0x230   : > { %v4200_v28 = vpop.eup %3236 }
 0x231   : > { %v4202_v45 = vpop.eup %3238 }
 0x232   : > { %v4205_v47 = vpop.eup %3240 }
 0x233   : > { %v4209_v48 = vpop.eup %3242 }
 0x234   : > { %1461 = vperm.xlu0 %3109, %v4190_v33  }
 0x235   : > { %1467 = vperm.xlu1 %3110, %v4192_v43  }
 0x236   : > { %1464 = vperm.xlu2 %3111, %v4195_v42  }
 0x23c   : > { %1470 = vperm.xlu0 %3109, %v4200_v28  }
 0x23d   : > { %1476 = vperm.xlu1 %3110, %v4202_v45  }
 0x23e   : > { %1473 = vperm.xlu2 %3111, %v4205_v47  }
 0x244   : > { %1479 = vperm.xlu0 %3109, %v4209_v48  }
 0x247   : > { %v1393_v30 = vpop.permute.xlu2 %1392 }
 0x248   : > { %v1483_v25 = vperm.slane %v1393_v30, %v3928_v52 }
 0x24f   : > { %v1396_v50 = vpop.permute.xlu2 %1395 }
 0x250   : > { %v1484_v8 = vperm.slane %v1396_v50, %v3928_v52 }
 0x257   : > { %v1402_v37 = vpop.permute.xlu2 %1401 }
 0x258   : > { %v1486_v16 = vperm.slane %v1402_v37, %v3928_v52 }
 0x25d   : > { %v1387_v56 = vpop.permute.xlu0 %1386 }
 0x25e   : > { %v1390_v40 = vpop.permute.xlu1 %1389  ;;  %v1481_v15 = vperm.slane %v1387_v56, %v3928_v52 }
 0x25f   : > { %v1482_v12 = vperm.slane %v1390_v40, %v3928_v52  ;;  %v1411_v38 = vpop.permute.xlu2 %1410 }
 0x260   : > { %v1489_v17 = vperm.slane %v1411_v38, %v3928_v52 }
 0x261   : > { %v1513_v62 = vsel %vm1137_vm2, %v1482_v12, %v1481_v15 }
 0x262   : > { %v1514_v3 = vsel %vm1139_vm3, %v1483_v25, %v1513_v62 }
 0x263   : > { %v1515_v44 = vsel %vm1141_vm4, %v1484_v8, %v1514_v3 }
 0x265   : > { %v1408_v31 = vpop.permute.xlu0 %1407 }
 0x266   : > { %v1399_v1 = vpop.permute.xlu1 %1398  ;;  %v1488_v26 = vperm.slane %v1408_v31, %v3928_v52 }
 0x267   : > { %v1485_v22 = vperm.slane %v1399_v1, %v3928_v52  ;;  %v1420_v35 = vpop.permute.xlu2 %1419 }
 0x268   : > { %v1492_v37 = vperm.slane %v1420_v35, %v3928_v52 }
 0x269   : > { %v1516_v51 = vsel %vm1143_vm5, %v1485_v22, %v1515_v44 }
 0x26a   : > { %v1517_v32 = vsel %vm1145_vm6, %v1486_v16, %v1516_v51 }
 0x26e   : > { %v1405_v53 = vpop.permute.xlu1 %1404 }
 0x26f   : > { %v1487_v57 = vperm.slane %v1405_v53, %v3928_v52  ;;  %v1429_v50 = vpop.permute.xlu2 %1428 }
 0x270   : > { %v1495_v22 = vperm.slane %v1429_v50, %v3928_v52 }
 0x271   : > { %v1518_v10 = vsel %vm1147_vm7, %v1487_v57, %v1517_v32 }
 0x272   : > { %v1519_v63 = vsel %vm1149_vm8, %v1488_v26, %v1518_v10 }
 0x273   : > { %v1545_v2 = vsel %vm1176_vm9, %v1519_v63, 0.0 }
 0x274   : > { %1546 = vadd.xlane.f32.xlu2 %v1545_v2  ;;  %v1417_v0 = vpop.permute.xlu0 %1416 }
 0x275   : > { %v1491_v30 = vperm.slane %v1417_v0, %v3928_v52 }
 0x276   : > { %v1414_v36 = vpop.permute.xlu1 %1413 }
 0x277   : > { %v1490_v29 = vperm.slane %v1414_v36, %v3928_v52 }
 0x278   : > { %v1438_v44 = vpop.permute.xlu2 %1437 }
 0x279   : > { %v1520_v24 = vsel %vm1137_vm2, %v1490_v29, %v1489_v17  ;;  %v1498_v10 = vperm.slane %v1438_v44, %v3928_v52 }
 0x27a   : > { %v1521_v40 = vsel %vm1139_vm3, %v1491_v30, %v1520_v24 }
 0x27b   : > { %v1522_v62 = vsel %vm1141_vm4, %v1492_v37, %v1521_v40 }
 0x27c   : > { %v1426_v15 = vpop.permute.xlu0 %1425 }
 0x27d   : > { %v1494_v25 = vperm.slane %v1426_v15, %v3928_v52 }
 0x27e   : > { %v1423_v56 = vpop.permute.xlu1 %1422 }
 0x27f   : > { %v1493_v12 = vperm.slane %v1423_v56, %v3928_v52 }
 0x280   : > { %v1447_v26 = vpop.permute.xlu2 %1446 }
 0x281   : > { %v1523_v1 = vsel %vm1143_vm5, %v1493_v12, %v1522_v62  ;;  %v1501_v24 = vperm.slane %v1447_v26, %v3928_v52 }
 0x282   : > { %v1524_v3 = vsel %vm1145_vm6, %v1494_v25, %v1523_v1 }
 0x283   : > { %v1525_v51 = vsel %vm1147_vm7, %v1495_v22, %v1524_v3 }
 0x286   : > { %v1432_v8 = vpop.permute.xlu1 %1431 }
 0x287   : > { %v1496_v38 = vperm.slane %v1432_v8, %v3928_v52 }
 0x288   : > { %v1456_v30 = vpop.permute.xlu2 %1455 }
 0x289   : > { %v1526_v31 = vsel %vm1149_vm8, %v1496_v38, %v1525_v51  ;;  %v1504_v15 = vperm.slane %v1456_v30, %v3928_v52 }
 0x28a   : > { %v1548_v16 = vsel %vm1176_vm9, %v1526_v31, 0.0 }
 0x28b   : > { %1549 = vadd.xlane.f32.xlu1 %v1548_v16 }
 0x28e   : > { %v1435_v53 = vpop.permute.xlu0 %1434 }
 0x28f   : > { %v1441_v57 = vpop.permute.xlu1 %1440  ;;  %v1497_v32 = vperm.slane %v1435_v53, %v3928_v52 }
 0x290   : > { %v1499_v63 = vperm.slane %v1441_v57, %v3928_v52  ;;  %v1465_v22 = vpop.permute.xlu2 %1464 }
 0x291   : > { %v1527_v2 = vsel %vm1137_vm2, %v1498_v10, %v1497_v32  ;;  %v1507_v16 = vperm.slane %v1465_v22, %v3928_v52 }
 0x292   : > { %v1528_v29 = vsel %vm1139_vm3, %v1499_v63, %v1527_v2 }
 0x296   : > { %v1444_v35 = vpop.permute.xlu0 %1443 }
 0x297   : > { %v1450_v0 = vpop.permute.xlu1 %1449  ;;  %v1500_v36 = vperm.slane %v1444_v35, %v3928_v52 }
 0x298   : > { %v1502_v40 = vperm.slane %v1450_v0, %v3928_v52  ;;  %v1474_v10 = vpop.permute.xlu2 %1473 }
 0x299   : > { %v1529_v17 = vsel %vm1141_vm4, %v1500_v36, %v1528_v29  ;;  %v1510_v35 = vperm.slane %v1474_v10, %v3928_v52 }
 0x29a   : > { %v1530_v50 = vsel %vm1143_vm5, %v1501_v24, %v1529_v17 }
 0x29b   : > { %v1531_v62 = vsel %vm1145_vm6, %v1502_v40, %v1530_v50 }
 0x29e   : > { %v1453_v56 = vpop.permute.xlu0 %1452 }
 0x29f   : > { %v1459_v37 = vpop.permute.xlu1 %1458  ;;  %v1503_v12 = vperm.slane %v1453_v56, %v3928_v52 }
 0x2a0   : > { %v1505_v44 = vperm.slane %v1459_v37, %v3928_v52 }
 0x2a1   : > { %v1532_v1 = vsel %vm1147_vm7, %v1503_v12, %v1531_v62 }
 0x2a2   : > { %v1533_v25 = vsel %vm1149_vm8, %v1504_v15, %v1532_v1 }
 0x2a3   : > { %v1551_v3 = vsel %vm1176_vm9, %v1533_v25, 0.0 }
 0x2a4   : > { %1552 = vadd.xlane.f32.xlu0 %v1551_v3 }
 0x2a6   : > { %v1462_v8 = vpop.permute.xlu0 %1461 }
 0x2a7   : > { %v1506_v38 = vperm.slane %v1462_v8, %v3928_v52  ;;  %v1468_v51 = vpop.permute.xlu1 %1467 }
 0x2a8   : > { %v1508_v26 = vperm.slane %v1468_v51, %v3928_v52 }
 0x2a9   : > { %v1534_v31 = vsel %vm1137_vm2, %v1506_v38, %v1505_v44 }
 0x2aa   : > { %v1535_v53 = vsel %vm1139_vm3, %v1507_v16, %v1534_v31 }
 0x2ab   : > { %v1536_v63 = vsel %vm1141_vm4, %v1508_v26, %v1535_v53 }
 0x2ae   : > { %v1471_v57 = vpop.permute.xlu0 %1470 }
 0x2af   : > { %v1509_v32 = vperm.slane %v1471_v57, %v3928_v52  ;;  %v1477_v0 = vpop.permute.xlu1 %1476 }
 0x2b0   : > { %v1511_v29 = vperm.slane %v1477_v0, %v3928_v52 }
 0x2b1   : > { %v1537_v2 = vsel %vm1143_vm5, %v1509_v32, %v1536_v63 }
 0x2b2   : > { %v1538_v36 = vsel %vm1145_vm6, %v1510_v35, %v1537_v2 }
 0x2b3   : > { %v1539_v30 = vsel %vm1147_vm7, %v1511_v29, %v1538_v36 }
 0x2b6   : > { %v1480_v17 = vpop.permute.xlu0 %1479 }
 0x2b7   : > { %v1512_v24 = vperm.slane %v1480_v17, %v3928_v52 }
 0x2b9   : > { %v1540_v50 = vsel %vm1149_vm8, %v1512_v24, %v1539_v30 }
 0x2ba   : > { %v1554_v40 = vsel %vm1176_vm9, %v1540_v50, 0.0 }
 0x2bb   : > { %1555 = vadd.xlane.f32.xlu2 %v1554_v40 }
 0x2e7   : > { %v1547_v56 = vpop.xlane.xlu2 %1546 }
 0x2e8   : > { %3244 = vrcp.f32 %v1547_v56  ;;  %v1568_v62 = vand.u32 2147483648, %v1547_v56  ;;  %v1566_v25 = vand.u32 2147483647, %v1547_v56  ;;  %vm1562_vm11 = vweird.f32 %v1547_v56 }
 0x2ea   : > { %v1569_v22 = vor.u32 1.1754944e-38, %v1568_v62  ;;  %vm1567_vm13 = vcmp.eq.f32.partialorder %v1566_v25, 8.507059e+37 }
 0x2ee   : > { %v3245_v37 = vpop.eup %3244 }
 0x2ef   : > { %v1558_v12 = vmul.f32 %v3245_v37, %v1547_v56  ;;  %vm1563_vm10 = vweird.f32 %v3245_v37 }
 0x2f0   : > { %vm1564_vm12 = vmor %vm1562_vm11, %vm1563_vm10 }
 0x2f1   : > { %v1559_v15 = vsub.f32 1.0, %v1558_v12 }
 0x2f3   : > { %v1560_v1 = vmul.f32 %v3245_v37, %v1559_v15 }
 0x2f5   : > { %v1561_v3 = vadd.f32 %v3245_v37, %v1560_v1 }
 0x2f7   : > { %v1565_v8 = vsel %vm1564_vm12, %v3245_v37, %v1561_v3 }
 0x2f8   : > { %v1570_v38 = vsel %vm1567_vm13, %v1569_v22, %v1565_v8 }
 0x2f9   : > { %v1617_v44 = vperm.slane %v1570_v38, 0  ;;  %v1619_v51 = vperm.slane %v1570_v38, 2  ;;  %v1618_v31 = vperm.slane %v1570_v38, 1  ;;  %v1620_v32 = vperm.slane %v1570_v38, 3 }
 0x2fa   : > { %v1621_v10 = vperm.slane %v1570_v38, 4  ;;  %v1622_v63 = vperm.slane %v1570_v38, 5 }
 0x2fb   : > { %v1681_v16 = vmul.f32 %v4090_v14, %v1617_v44  ;;  %v1683_v53 = vmul.f32 %v4095_v20, %v1619_v51  ;;  %v1682_v57 = vmul.f32 %v4092_v18, %v1618_v31  ;;  %v1684_v2 = vmul.f32 %v4106_v54, %v1620_v32  ;;  %v2318_v31 = vld [vmem:[%s4699_s9 + $0x18] sm:$0xff] }
 0x2fc   : > { %v1685_v35 = vmul.f32 %v4103_v27, %v1621_v10  ;;  %v1686_v0 = vmul.f32 %v4116_v60, %v1622_v63  ;;  %v1623_v18 = vperm.slane %v1570_v38, 6  ;;  %v1624_v20 = vperm.slane %v1570_v38, 7  ;;  %2335 = vmatpush.msrb.mxu3 %v2318_v31 }
 0x2fd   : > { %1747 = vperm.xlu1 %3110, %v1681_v16   ;;  %1757 = vperm.xlu0 %3109, %v1683_v53   ;;  %v2317_v16 = vld [vmem:[%s4699_s9 + $0x10] sm:$0xff] }
 0x2fe   : > { %1752 = vperm.xlu2 %3111, %v1682_v57   ;;  %v1550_v26 = vpop.xlane.xlu1 %1549  ;;  %v1687_v50 = vmul.f32 %v4113_v39, %v1623_v18  ;;  %v1688_v54 = vmul.f32 %v4101_v23, %v1624_v20  ;;  %2336 = vmatpush.msrb.mxu3 %v2317_v16 }
 0x2ff   : > { %3246 = vrcp.f32 %v1550_v26  ;;  %v1582_v17 = vand.u32 2147483648, %v1550_v26  ;;  %v1580_v30 = vand.u32 2147483647, %v1550_v26  ;;  %vm1576_vm15 = vweird.f32 %v1550_v26 }
 0x301   : > { %v1583_v27 = vor.u32 1.1754944e-38, %v1582_v17  ;;  %vm1581_vm10 = vcmp.eq.f32.partialorder %v1580_v30, 8.507059e+37 }
 0x305   : > { %v3247_v36 = vpop.eup %3246  ;;  %1762 = vperm.xlu1 %3110, %v1684_v2   ;;  %1767 = vperm.xlu0 %3109, %v1685_v35   ;;  %v2315_v2 = vld [vmem:[%s4699_s9] sm:$0xff] }
 0x306   : > { %v1572_v14 = vmul.f32 %v3247_v36, %v1550_v26  ;;  %1772 = vperm.xlu2 %3111, %v1686_v0   ;;  %vm1577_vm14 = vweird.f32 %v3247_v36  ;;  %v3292_v0 = vld [vmem:[#allocation2] sm:$0xff] }
 0x307   : > { %vm1578_vm0 = vmor %vm1576_vm15, %vm1577_vm14 }
 0x308   : > { %v1573_v29 = vsub.f32 1.0, %v1572_v14 }
 0x30a   : > { %v1574_v24 = vmul.f32 %v3247_v36, %v1573_v29 }
 0x30c   : > { %v1575_v40 = vadd.f32 %v3247_v36, %v1574_v24 }
 0x30d   : > { %1777 = vperm.xlu1 %3110, %v1687_v50   ;;  %1782 = vperm.xlu0 %3109, %v1688_v54   ;;  %v3293_v54 = vld [vmem:[#allocation2 + $0x8] sm:$0xff] }
 0x30e   : > { %v1579_v60 = vsel %vm1578_vm0, %v3247_v36, %v1575_v40 }
 0x30f   : > { %v1584_v56 = vsel %vm1581_vm10, %v1583_v27, %v1579_v60 }
 0x310   : > { %v1625_v37 = vperm.slane %v1584_v56, 0  ;;  %v1626_v12 = vperm.slane %v1584_v56, 1  ;;  %v1627_v15 = vperm.slane %v1584_v56, 2  ;;  %v1628_v23 = vperm.slane %v1584_v56, 3 }
 0x311   : > { %v1629_v3 = vperm.slane %v1584_v56, 4  ;;  %v1630_v22 = vperm.slane %v1584_v56, 5  ;;  %v1632_v51 = vperm.slane %v1584_v56, 7 }
 0x312   : > { %v1689_v62 = vmul.f32 %v4127_v6, %v1625_v37  ;;  %v1690_v1 = vmul.f32 %v4125_v5, %v1626_v12  ;;  %v1691_v39 = vmul.f32 %v4122_v61, %v1627_v15  ;;  %v1692_v8 = vmul.f32 %v4138_v55, %v1628_v23  ;;  %v3294_v12 = vld [vmem:[#allocation2 + $0x10] sm:$0xff] }
 0x313   : > { %v1693_v38 = vmul.f32 %v4136_v9, %v1629_v3  ;;  %v1694_v44 = vmul.f32 %v4133_v7, %v1630_v22  ;;  %v1631_v6 = vperm.slane %v1584_v56, 6  ;;  %v2316_v7 = vld [vmem:[%s4699_s9 + $0x8] sm:$0xff]  ;;  %v1696_v32 = vmul.f32 %v4145_v34, %v1632_v51 }
 0x314   : > { %1787 = vperm.xlu2 %3111, %v1689_v62   ;;  %2337 = vmatpush.msrb.mxu3 %v2316_v7 }
 0x315   : > { %1792 = vperm.xlu1 %3110, %v1690_v1   ;;  %1797 = vperm.xlu0 %3109, %v1691_v39   ;;  %v1695_v53 = vmul.f32 %v4147_v41, %v1631_v6 }
 0x316   : > { %2338 = vmatpush.msrb.mxu3 %v2315_v2 }
 0x317   : > { %v1553_v25 = vpop.xlane.xlu0 %1552  ;;  %2967 = vmatmul.msk.f32.vlgmr.msrb.gmra.mxu3 %vm705_vm1, %v3292_v0  ;;  %v2162_v0 = vld [vmem:[%s4696_s6 + $0x8] sm:$0xff] }
 0x318   : > { %3248 = vrcp.f32 %v1553_v25  ;;  %v1596_v9 = vand.u32 2147483648, %v1553_v25  ;;  %v1594_v26 = vand.u32 2147483647, %v1553_v25  ;;  %vm1590_vm12 = vweird.f32 %v1553_v25 }
 0x31a   : > { %v1597_v63 = vor.u32 1.1754944e-38, %v1596_v9  ;;  %vm1595_vm14 = vcmp.eq.f32.partialorder %v1594_v26, 8.507059e+37  ;;  %v1715_v26 = vld [vmem:[#allocation7 + $0x10] sm:$0xff] }
 0x31c   : > { %1802 = vperm.xlu2 %3111, %v1692_v8  }
 0x31d   : > { %1807 = vperm.xlu1 %3110, %v1693_v38   ;;  %1812 = vperm.xlu0 %3109, %v1694_v44   ;;  %v3295_v38 = vld [vmem:[#allocation2 + $0x18] sm:$0xff] }
 0x31e   : > { %v3249_v5 = vpop.eup %3248 }
 0x31f   : > { %v1586_v61 = vmul.f32 %v3249_v5, %v1553_v25  ;;  %vm1591_vm11 = vweird.f32 %v3249_v5  ;;  %2968 = vmatmul.msk.f32.gmra.mxu3 %vm705_vm1, %v3293_v54 }
 0x320   : > { %vm1592_vm13 = vmor %vm1590_vm12, %vm1591_vm11 }
 0x321   : > { %v1587_v55 = vsub.f32 1.0, %v1586_v61 }
 0x323   : > { %v1588_v57 = vmul.f32 %v3249_v5, %v1587_v55 }
 0x324   : > { %1817 = vperm.xlu2 %3111, %v1695_v53   ;;  %v1714_v53 = vld [vmem:[#allocation7 + $0x8] sm:$0xff] }
 0x325   : > { %v1589_v10 = vadd.f32 %v3249_v5, %v1588_v57  ;;  %1822 = vperm.xlu1 %3110, %v1696_v32   ;;  %v1718_v57 = vld [vmem:[#allocation7 + $0x28] sm:$0xff] }
 0x327   : > { %v1593_v35 = vsel %vm1592_vm13, %v3249_v5, %v1589_v10  ;;  %2969 = vmatmul.msk.f32.gmra.mxu3 %vm705_vm1, %v3294_v12  ;;  %v2166_v12 = vld [vmem:[%s4697_s7 + $0x8] sm:$0xff] }
 0x328   : > { %v1598_v41 = vsel %vm1595_vm14, %v1597_v63, %v1593_v35 }
 0x329   : > { %v1635_v36 = vperm.slane %v1598_v41, 2  ;;  %v1634_v34 = vperm.slane %v1598_v41, 1  ;;  %v1633_v14 = vperm.slane %v1598_v41, 0  ;;  %v1638_v24 = vperm.slane %v1598_v41, 5 }
 0x32a   : > { %v1637_v30 = vperm.slane %v1598_v41, 4  ;;  %v1636_v50 = vperm.slane %v1598_v41, 3  ;;  %v1640_v60 = vperm.slane %v1598_v41, 7  ;;  %v1639_v37 = vperm.slane %v1598_v41, 6 }
 0x32b   : > { %v1699_v18 = vmul.f32 %v4156_v58, %v1635_v36  ;;  %v1698_v20 = vmul.f32 %v4159_v21, %v1634_v34  ;;  %v1697_v29 = vmul.f32 %v4154_v13, %v1633_v14  ;;  %v1702_v40 = vmul.f32 %v4168_v49, %v1638_v24 }
 0x32c   : > { %v1701_v27 = vmul.f32 %v4171_v46, %v1637_v30  ;;  %v1700_v58 = vmul.f32 %v4166_v11, %v1636_v50  ;;  %v1704_v49 = vmul.f32 %v4183_v59, %v1640_v60  ;;  %v1703_v11 = vmul.f32 %v4180_v4, %v1639_v37  ;;  %v697_v30 = vld [vmem:[%s3771_s26] sm:$0xff] }
 0x32d   : > { %1837 = vperm.xlu1 %3110, %v1699_v18   ;;  %1832 = vperm.xlu2 %3111, %v1698_v20   ;;  %v2168_v18 = vld [vmem:[%s4697_s7 + $0x18] sm:$0xff]  ;;  %v2161_v20 = vld [vmem:[%s4696_s6] sm:$0xff] }
 0x32e   : > { %1827 = vperm.xlu0 %3109, %v1697_v29   ;;  %v1556_v17 = vpop.xlane.xlu2 %1555  ;;  %2249 = vmatpush.msrb.mxu1 %v2168_v18  ;;  %v1721_v50 = vld [vmem:[#allocation7 + $0x40] sm:$0xff] }
 0x32f   : > { %3250 = vrcp.f32 %v1556_v17  ;;  %v1610_v15 = vand.u32 2147483648, %v1556_v17  ;;  %v1608_v1 = vand.u32 2147483647, %v1556_v17  ;;  %vm1604_vm0 = vweird.f32 %v1556_v17  ;;  %2970 = vmatmul.msk.f32.gmra.mxu3 %vm705_vm1, %v3295_v38  ;;  %v1717_v60 = vld [vmem:[#allocation7 + $0x20] sm:$0xff] }
 0x331   : > { %v1611_v39 = vor.u32 1.1754944e-38, %v1610_v15  ;;  %vm1609_vm11 = vcmp.eq.f32.partialorder %v1608_v1, 8.507059e+37 }
 0x335   : > { %v3251_v21 = vpop.eup %3250  ;;  %1852 = vperm.xlu1 %3110, %v1702_v40   ;;  %1847 = vperm.xlu2 %3111, %v1701_v27   ;;  %v2167_v40 = vld [vmem:[%s4697_s7 + $0x10] sm:$0xff] }
 0x336   : > { %v1600_v13 = vmul.f32 %v3251_v21, %v1556_v17  ;;  %1842 = vperm.xlu0 %3109, %v1700_v58   ;;  %vm1605_vm15 = vweird.f32 %v3251_v21  ;;  %2250 = vmatpush.msrb.mxu1 %v2167_v40 }
 0x337   : > { %vm1606_vm10 = vmor %vm1604_vm0, %vm1605_vm15 }
 0x338   : > { %v1601_v56 = vsub.f32 1.0, %v1600_v13  ;;  %v1716_v13 = vld [vmem:[#allocation7 + $0x18] sm:$0xff]  ;;  %2251 = vmatpush.msrb.mxu1 %v2166_v12 }
 0x33a   : > { %v1602_v62 = vmul.f32 %v3251_v21, %v1601_v56 }
 0x33c   : > { %v1603_v46 = vadd.f32 %v3251_v21, %v1602_v62 }
 0x33d   : > { %1862 = vperm.xlu2 %3111, %v1704_v49  }
 0x33e   : > { %v1607_v23 = vsel %vm1606_vm10, %v3251_v21, %v1603_v46  ;;  %1857 = vperm.xlu0 %3109, %v1703_v11  }
 0x33f   : > { %v1612_v25 = vsel %vm1609_vm11, %v1611_v39, %v1607_v23 }
 0x340   : > { %v1641_v3 = vperm.slane %v1612_v25, 0  ;;  %v1643_v22 = vperm.slane %v1612_v25, 2  ;;  %v1642_v8 = vperm.slane %v1612_v25, 1  ;;  %v1644_v4 = vperm.slane %v1612_v25, 3 }
 0x341   : > { %v1646_v6 = vperm.slane %v1612_v25, 5  ;;  %v1645_v61 = vperm.slane %v1612_v25, 4  ;;  %v1648_v55 = vperm.slane %v1612_v25, 7 }
 0x342   : > { %v1705_v44 = vmul.f32 %v4178_v19, %v1641_v3  ;;  %v1707_v59 = vmul.f32 %v4195_v42, %v1643_v22  ;;  %v1706_v5 = vmul.f32 %v4190_v33, %v1642_v8  ;;  %v1708_v51 = vmul.f32 %v4192_v43, %v1644_v4  ;;  %v2165_v3 = vld [vmem:[%s4697_s7] sm:$0xff] }
 0x343   : > { %v1710_v31 = vmul.f32 %v4205_v47, %v1646_v6  ;;  %v1709_v16 = vmul.f32 %v4200_v28, %v1645_v61  ;;  %v1647_v19 = vperm.slane %v1612_v25, 6  ;;  %v1712_v33 = vmul.f32 %v4209_v48, %v1648_v55  ;;  %v2164_v28 = vld [vmem:[%s4696_s6 + $0x18] sm:$0xff]  ;;  %v1713_v47 = vld [vmem:[#allocation7] sm:$0xff]  ;;  %2252 = vmatpush.msrb.mxu1 %v2165_v3 }
 0x344   : > { %1867 = vperm.xlu1 %3110, %v1705_v44   ;;  %2290 = vmatpush.msrb.mxu2 %v2164_v28 }
 0x345   : > { %1877 = vperm.xlu2 %3111, %v1707_v59   ;;  %v1711_v42 = vmul.f32 %v4202_v45, %v1647_v19  ;;  %v2163_v45 = vld [vmem:[%s4696_s6 + $0x10] sm:$0xff] }
 0x346   : > { %1872 = vperm.xlu0 %3109, %v1706_v5   ;;  %2291 = vmatpush.msrb.mxu2 %v2163_v45 }
 0x348   : > { %2292 = vmatpush.msrb.mxu2 %v2162_v0 }
 0x34a   : > { %2293 = vmatpush.msrb.mxu2 %v2161_v20 }
 0x34b   : > { %2963 = vmatmul.msk.f32.vlgmr.msrb.gmra.mxu2 %vm705_vm1, %v697_v30 }
 0x34c   : > { %1882 = vperm.xlu1 %3110, %v1708_v51  }
 0x34d   : > { %1892 = vperm.xlu2 %3111, %v1710_v31   ;;  %v1724_v31 = vld [vmem:[#allocation7 + $0x58] sm:$0xff] }
 0x34e   : > { %1887 = vperm.xlu0 %3109, %v1709_v16  }
 0x354   : > { %1897 = vperm.xlu1 %3110, %v1711_v42  }
 0x356   : > { %1902 = vperm.xlu0 %3109, %v1712_v33  }
 0x358   : > { %v1753_v7 = vpop.permute.xlu2 %1752 }
 0x359   : > { %v1906_v43 = vmul.f32 %v1753_v7, %v1714_v53  ;;  %v2630_v58 = vperm.slane %v1753_v7, %v3928_v52  ;;  %v1719_v7 = vld [vmem:[#allocation7 + $0x30] sm:$0xff] }
 0x35b   : > { %v1944_v48 = vsel %vm705_vm1, %v1906_v43, 0.0 }
 0x35c   : > { %v1945_v36 = vrot.slane %v1944_v48, 4 }
 0x35e   : > { %v1946_v27 = vadd.f32 %v1945_v36, %v1944_v48 }
 0x360   : > { %v4324_v9 = vpop.permute.xlu2 %1772  ;;  %v1947_v22 = vrot.slane %v1946_v27, 2 }
 0x361   : > { %v1910_v10 = vmul.f32 %v4324_v9, %v1718_v57 }
 0x362   : > { %v1948_v55 = vadd.f32 %v1947_v22, %v1946_v27 }
 0x363   : > { %v1972_v29 = vsel %vm705_vm1, %v1910_v10, 0.0 }
 0x364   : > { %v1973_v56 = vrot.slane %v1972_v29, 4  ;;  %v1949_v36 = vrot.slane %v1948_v55, 1 }
 0x366   : > { %v1974_v38 = vadd.f32 %v1973_v56, %v1972_v29 }
 0x368   : > { %v1975_v53 = vrot.slane %v1974_v38, 2 }
 0x36a   : > { %v1976_v20 = vadd.f32 %v1975_v53, %v1974_v38 }
 0x36e   : > { %v4333_v32 = vpop.permute.xlu2 %1787 }
 0x36f   : > { %v1748_v63 = vpop.permute.xlu1 %1747  ;;  %v1758_v2 = vpop.permute.xlu0 %1757  ;;  %v1913_v15 = vmul.f32 %v4333_v32, %v1721_v50 }
 0x370   : > { %v1905_v35 = vmul.f32 %v1748_v63, %v1713_v47  ;;  %v1907_v41 = vmul.f32 %v1758_v2, %v1715_v26  ;;  %v2629_v24 = vperm.slane %v1748_v63, %v3928_v52  ;;  %v2631_v1 = vperm.slane %v1758_v2, %v3928_v52  ;;  %v1720_v47 = vld [vmem:[#allocation7 + $0x38] sm:$0xff] }
 0x371   : > { %v1993_v59 = vsel %vm705_vm1, %v1913_v15, 0.0  ;;  %v2634_v26 = vperm.slane %v4324_v9, %v3928_v52  ;;  %v1722_v15 = vld [vmem:[#allocation7 + $0x48] sm:$0xff] }
 0x372   : > { %v1937_v34 = vsel %vm705_vm1, %v1905_v35, 0.0  ;;  %v1951_v14 = vsel %vm705_vm1, %v1907_v41, 0.0  ;;  %v2661_v62 = vsel %vm1137_vm2, %v2630_v58, %v2629_v24  ;;  %v1994_v43 = vrot.slane %v1993_v59, 4 }
 0x373   : > { %v1938_v17 = vrot.slane %v1937_v34, 4  ;;  %v1952_v54 = vrot.slane %v1951_v14, 4  ;;  %v2662_v5 = vsel %vm1139_vm3, %v2631_v1, %v2661_v62 }
 0x374   : > { %v1995_v29 = vadd.f32 %v1994_v43, %v1993_v59  ;;  %v1727_v59 = vld [vmem:[#allocation7 + $0x70] sm:$0xff] }
 0x375   : > { %v1939_v21 = vadd.f32 %v1938_v17, %v1937_v34  ;;  %v1953_v39 = vadd.f32 %v1952_v54, %v1951_v14 }
 0x376   : > { %v4355_v37 = vpop.permute.xlu2 %1802  ;;  %v1996_v62 = vrot.slane %v1995_v29, 2 }
 0x377   : > { %v1763_v49 = vpop.permute.xlu1 %1762  ;;  %v1768_v46 = vpop.permute.xlu0 %1767  ;;  %v1940_v11 = vrot.slane %v1939_v21, 2  ;;  %v1954_v51 = vrot.slane %v1953_v39, 2  ;;  %v1916_v45 = vmul.f32 %v4355_v37, %v1724_v31 }
 0x378   : > { %v1908_v23 = vmul.f32 %v1763_v49, %v1716_v13  ;;  %v1909_v25 = vmul.f32 %v1768_v46, %v1717_v60  ;;  %v2632_v8 = vperm.slane %v1763_v49, %v3928_v52  ;;  %v2633_v19 = vperm.slane %v1768_v46, %v3928_v52 }
 0x379   : > { %v1941_v61 = vadd.f32 %v1940_v11, %v1939_v21  ;;  %v1955_v35 = vadd.f32 %v1954_v51, %v1953_v39  ;;  %v2014_v24 = vsel %vm705_vm1, %v1916_v45, 0.0  ;;  %v1950_v13 = vadd.f32 %v1949_v36, %v1948_v55  ;;  %v1723_v11 = vld [vmem:[#allocation7 + $0x50] sm:$0xff] }
 0x37a   : > { %v1958_v44 = vsel %vm705_vm1, %v1908_v23, 0.0  ;;  %v1965_v6 = vsel %vm705_vm1, %v1909_v25, 0.0  ;;  %v2663_v33 = vsel %vm1141_vm4, %v2632_v8, %v2662_v5  ;;  %v2015_v1 = vrot.slane %v2014_v24, 4 }
 0x37b   : > { %v1959_v4 = vrot.slane %v1958_v44, 4  ;;  %v1966_v16 = vrot.slane %v1965_v6, 4  ;;  %v1942_v2 = vrot.slane %v1941_v61, 1  ;;  %v2664_v41 = vsel %vm1143_vm5, %v2633_v19, %v2663_v33  ;;  %v698_v33 = vld [vmem:[%s3771_s26 + $0x8] sm:$0xff] }
 0x37c   : > { %v2665_v50 = vsel %vm1145_vm6, %v2634_v26, %v2664_v41  ;;  %v1956_v27 = vrot.slane %v1955_v35, 1  ;;  %v1977_v39 = vrot.slane %v1976_v20, 1  ;;  %v2637_v23 = vperm.slane %v4333_v32, %v3928_v52  ;;  %2964 = vmatmul.msk.f32.gmra.mxu2 %vm705_vm1, %v698_v33  ;;  %v1725_v41 = vld [vmem:[#allocation7 + $0x60] sm:$0xff] }
 0x37d   : > { %v1960_v42 = vadd.f32 %v1959_v4, %v1958_v44  ;;  %v1967_v57 = vadd.f32 %v1966_v16, %v1965_v6  ;;  %v1943_v40 = vadd.f32 %v1942_v2, %v1941_v61  ;;  %v4395_v16 = vadd.f32 %v1996_v62, %v1995_v29 }
 0x37e   : > { %v4373_v28 = vpop.permute.xlu2 %1817  ;;  %v1957_v44 = vadd.f32 %v1956_v27, %v1955_v35  ;;  %v2016_v19 = vadd.f32 %v2015_v1, %v2014_v24  ;;  %v2640_v36 = vperm.slane %v4355_v37, %v3928_v52  ;;  %v1730_v24 = vld [vmem:[#allocation7 + $0x88] sm:$0xff] }
 0x37f   : > { %v1961_v48 = vrot.slane %v1960_v42, 2  ;;  %v1778_v10 = vpop.permute.xlu1 %1777  ;;  %v1783_v63 = vpop.permute.xlu0 %1782  ;;  %v1968_v34 = vrot.slane %v1967_v57, 2  ;;  %v2201_v38 = vsel %vm1137_vm2, %v1950_v13, %v1943_v40 }
 0x380   : > { %v1911_v0 = vmul.f32 %v1778_v10, %v1719_v7  ;;  %v2635_v14 = vperm.slane %v1778_v10, %v3928_v52  ;;  %v1912_v18 = vmul.f32 %v1783_v63, %v1720_v47  ;;  %v2636_v12 = vperm.slane %v1783_v63, %v3928_v52 }
 0x381   : > { %v1962_v17 = vadd.f32 %v1961_v48, %v1960_v42  ;;  %v1969_v60 = vadd.f32 %v1968_v34, %v1967_v57  ;;  %v1919_v7 = vmul.f32 %v4373_v28, %v1727_v59  ;;  %v1978_v47 = vadd.f32 %v1977_v39, %v1976_v20 }
 0x382   : > { %v1979_v9 = vsel %vm705_vm1, %v1911_v0, 0.0  ;;  %v1986_v54 = vsel %vm705_vm1, %v1912_v18, 0.0  ;;  %v2666_v58 = vsel %vm1147_vm7, %v2635_v14, %v2665_v50  ;;  %v2202_v26 = vsel %vm1139_vm3, %v1957_v44, %v2201_v38  ;;  %v1726_v14 = vld [vmem:[#allocation7 + $0x68] sm:$0xff] }
 0x383   : > { %v1980_v30 = vrot.slane %v1979_v9, 4  ;;  %v1987_v21 = vrot.slane %v1986_v54, 4  ;;  %v1963_v49 = vrot.slane %v1962_v17, 1  ;;  %v2667_v3 = vsel %vm1149_vm8, %v2636_v12, %v2666_v58 }
 0x384   : > { %2693 = vst.msk [vmem:[%s3790_s20] sm:$0xff] %vm1176_vm9, %v2667_v3  ;;  %v1970_v61 = vrot.slane %v1969_v60, 1  ;;  %v1998_v0 = vrot.slane %v4395_v16, 1  ;;  %v2017_v20 = vrot.slane %v2016_v19, 2  ;;  %v2035_v29 = vsel %vm705_vm1, %v1919_v7, 0.0  ;;  %v1733_v3 = vld [vmem:[#allocation7 + $0xa0] sm:$0xff] }
 0x385   : > { %v1981_v56 = vadd.f32 %v1980_v30, %v1979_v9  ;;  %v1988_v46 = vadd.f32 %v1987_v21, %v1986_v54  ;;  %v1964_v55 = vadd.f32 %v1963_v49, %v1962_v17  ;;  %v2036_v12 = vrot.slane %v2035_v29, 4 }
 0x386   : > { %v1971_v10 = vadd.f32 %v1970_v61, %v1969_v60 }
 0x387   : > { %v1982_v25 = vrot.slane %v1981_v56, 2  ;;  %v1793_v22 = vpop.permute.xlu1 %1792  ;;  %v4389_v8 = vpop.permute.xlu2 %1832  ;;  %v1989_v5 = vrot.slane %v1988_v46, 2  ;;  %v2203_v18 = vsel %vm1141_vm4, %v1964_v55, %v2202_v26  ;;  %v2037_v61 = vadd.f32 %v2036_v12, %v2035_v29 }
 0x388   : > { %v1914_v4 = vmul.f32 %v1793_v22, %v1722_v15  ;;  %v1798_v6 = vpop.permute.xlu0 %1797  ;;  %v2638_v32 = vperm.slane %v1793_v22, %v3928_v52  ;;  %v2643_v15 = vperm.slane %v4373_v28, %v3928_v52  ;;  %v1922_v62 = vmul.f32 %v4389_v8, %v1730_v24 }
 0x389   : > { %v1983_v51 = vadd.f32 %v1982_v25, %v1981_v56  ;;  %v1915_v31 = vmul.f32 %v1798_v6, %v1723_v11  ;;  %v1990_v53 = vadd.f32 %v1989_v5, %v1988_v46  ;;  %v2639_v48 = vperm.slane %v1798_v6, %v3928_v52 }
 0x38a   : > { %v2000_v42 = vsel %vm705_vm1, %v1914_v4, 0.0  ;;  %v2668_v35 = vsel %vm1137_vm2, %v2638_v32, %v2637_v23  ;;  %v2204_v56 = vsel %vm1143_vm5, %v1971_v10, %v2203_v18  ;;  %v1728_v4 = vld [vmem:[#allocation7 + $0x78] sm:$0xff]  ;;  %v2018_v6 = vadd.f32 %v2017_v20, %v2016_v19 }
 0x38b   : > { %v2001_v43 = vrot.slane %v2000_v42, 4  ;;  %v2007_v57 = vsel %vm705_vm1, %v1915_v31, 0.0  ;;  %v1984_v63 = vrot.slane %v1983_v51, 1  ;;  %v1991_v17 = vrot.slane %v1990_v53, 1 }
 0x38c   : > { %v2008_v45 = vrot.slane %v2007_v57, 4  ;;  %v2669_v54 = vsel %vm1139_vm3, %v2639_v48, %v2668_v35  ;;  %v2205_v38 = vsel %vm1145_vm6, %v1978_v47, %v2204_v56  ;;  %v2019_v18 = vrot.slane %v2018_v6, 1 }
 0x38d   : > { %v2002_v2 = vadd.f32 %v2001_v43, %v2000_v42  ;;  %v1985_v21 = vadd.f32 %v1984_v63, %v1983_v51  ;;  %v2670_v46 = vsel %vm1141_vm4, %v2640_v36, %v2669_v54  ;;  %v1992_v39 = vadd.f32 %v1991_v17, %v1990_v53 }
 0x38e   : > { %v2009_v34 = vadd.f32 %v2008_v45, %v2007_v57  ;;  %v2056_v51 = vsel %vm705_vm1, %v1922_v62, 0.0  ;;  %v2038_v17 = vrot.slane %v2037_v61, 2 }
 0x38f   : > { %v2003_v9 = vrot.slane %v2002_v2, 2  ;;  %v1808_v30 = vpop.permute.xlu1 %1807  ;;  %v4412_v13 = vpop.permute.xlu2 %1847  ;;  %v2206_v5 = vsel %vm1147_vm7, %v1985_v21, %v2205_v38  ;;  %v2057_v26 = vrot.slane %v2056_v51, 4  ;;  %v2020_v21 = vadd.f32 %v2019_v18, %v2018_v6  ;;  %v699_v38 = vld [vmem:[%s3771_s26 + $0x10] sm:$0xff] }
 0x390   : > { %v2010_v50 = vrot.slane %v2009_v34, 2  ;;  %v1917_v40 = vmul.f32 %v1808_v30, %v1725_v41  ;;  %v2641_v27 = vperm.slane %v1808_v30, %v3928_v52  ;;  %v1813_v58 = vpop.permute.xlu0 %1812  ;;  %v1925_v55 = vmul.f32 %v4412_v13, %v1733_v3  ;;  %2965 = vmatmul.msk.f32.gmra.mxu2 %vm705_vm1, %v699_v38 }
 0x391   : > { %v2004_v37 = vadd.f32 %v2003_v9, %v2002_v2  ;;  %v1918_v60 = vmul.f32 %v1813_v58, %v1726_v14  ;;  %v2642_v28 = vperm.slane %v1813_v58, %v3928_v52  ;;  %v2207_v33 = vsel %vm1149_vm8, %v1992_v39, %v2206_v5 }
 0x392   : > { %v2021_v1 = vsel %vm705_vm1, %v1917_v40, 0.0  ;;  %v2011_v23 = vadd.f32 %v2010_v50, %v2009_v34  ;;  %v2671_v25 = vsel %vm1143_vm5, %v2641_v27, %v2670_v46  ;;  %2959 = vmatmul.msk.f32.vlgmr.msrb.gmra.mxu1 %vm705_vm1, %v2207_v33  ;;  %v1999_v2 = vadd.f32 %v1998_v0, %v4395_v16  ;;  %v1736_v34 = vld [vmem:[#allocation7 + $0xb8] sm:$0xff]  ;;  %v1731_v50 = vld [vmem:[#allocation7 + $0x90] sm:$0xff]  ;;  %v1729_v0 = vld [vmem:[#allocation7 + $0x80] sm:$0xff] }
 0x393   : > { %v2022_v49 = vrot.slane %v2021_v1, 4  ;;  %v2028_v11 = vsel %vm705_vm1, %v1918_v60, 0.0  ;;  %v2005_v44 = vrot.slane %v2004_v37, 1  ;;  %v2672_v42 = vsel %vm1145_vm6, %v2642_v28, %v2671_v25  ;;  %v1732_v33 = vld [vmem:[#allocation7 + $0x98] sm:$0xff] }
 0x394   : > { %v2029_v22 = vrot.slane %v2028_v11, 4  ;;  %v2012_v53 = vrot.slane %v2011_v23, 1  ;;  %v2673_v48 = vsel %vm1147_vm7, %v2643_v15, %v2672_v42  ;;  %v2077_v35 = vsel %vm705_vm1, %v1925_v55, 0.0 }
 0x395   : > { %v2023_v59 = vadd.f32 %v2022_v49, %v2021_v1  ;;  %v2006_v47 = vadd.f32 %v2005_v44, %v2004_v37  ;;  %v2058_v24 = vadd.f32 %v2057_v26, %v2056_v51  ;;  %v2078_v54 = vrot.slane %v2077_v35, 4 }
 0x396   : > { %v2030_v32 = vadd.f32 %v2029_v22, %v2028_v11  ;;  %v2013_v20 = vadd.f32 %v2012_v53, %v2011_v23  ;;  %v2039_v15 = vadd.f32 %v2038_v17, %v2037_v61 }
 0x397   : > { %v2024_v31 = vrot.slane %v2023_v59, 2  ;;  %v1823_v7 = vpop.permute.xlu1 %1822  ;;  %v4438_v14 = vpop.permute.xlu2 %1862  ;;  %v2208_v9 = vsel %vm1137_vm2, %v2006_v47, %v1999_v2  ;;  %v2059_v62 = vrot.slane %v2058_v24, 2  ;;  %v2079_v46 = vadd.f32 %v2078_v54, %v2077_v35 }
 0x398   : > { %v2031_v43 = vrot.slane %v2030_v32, 2  ;;  %v1920_v57 = vmul.f32 %v1823_v7, %v1728_v4  ;;  %v2644_v19 = vperm.slane %v1823_v7, %v3928_v52  ;;  %v1928_v16 = vmul.f32 %v4438_v14, %v1736_v34 }
 0x399   : > { %v2025_v45 = vadd.f32 %v2024_v31, %v2023_v59  ;;  %v2209_v12 = vsel %vm1139_vm3, %v2013_v20, %v2208_v9  ;;  %v2040_v4 = vrot.slane %v2039_v15, 1  ;;  %v2060_v6 = vadd.f32 %v2059_v62, %v2058_v24 }
 0x39a   : > { %v2042_v10 = vsel %vm705_vm1, %v1920_v57, 0.0  ;;  %v2674_v63 = vsel %vm1149_vm8, %v2644_v19, %v2673_v48  ;;  %v2032_v41 = vadd.f32 %v2031_v43, %v2030_v32  ;;  %v2098_v11 = vsel %vm705_vm1, %v1928_v16, 0.0  ;;  %v1734_v32 = vld [vmem:[#allocation7 + $0xa8] sm:$0xff]  ;;  %v1739_v57 = vld [vmem:[#allocation7 + $0xd0] sm:$0xff] }
 0x39b   : > { %v2043_v36 = vrot.slane %v2042_v10, 4  ;;  %2694 = vst.msk [vmem:[%s3790_s20 + $0x8] sm:$0xff] %vm1176_vm9, %v2674_v63  ;;  %v2026_v29 = vrot.slane %v2025_v45, 1  ;;  %v2210_v22 = vsel %vm1141_vm4, %v2020_v21, %v2209_v12  ;;  %v2099_v61 = vrot.slane %v2098_v11, 4 }
 0x39c   : > { %v2033_v40 = vrot.slane %v2032_v41, 1  ;;  %v2646_v31 = vperm.slane %v4389_v8, %v3928_v52  ;;  %v2080_v7 = vrot.slane %v2079_v46, 2  ;;  %v2061_v2 = vrot.slane %v2060_v6, 1 }
 0x39d   : > { %v2044_v30 = vadd.f32 %v2043_v36, %v2042_v10  ;;  %v2027_v37 = vadd.f32 %v2026_v29, %v2025_v45  ;;  %v2100_v8 = vadd.f32 %v2099_v61, %v2098_v11 }
 0x39e   : > { %v2034_v23 = vadd.f32 %v2033_v40, %v2032_v41  ;;  %v2041_v41 = vadd.f32 %v2040_v4, %v2039_v15  ;;  %v700_v4 = vld [vmem:[%s3771_s26 + $0x18] sm:$0xff]  ;;  %s3550_s26 = smov 64  }
 0x39f   : > { %v2045_v27 = vrot.slane %v2044_v30, 2  ;;  %v1838_v58 = vpop.permute.xlu1 %1837  ;;  %v2211_v5 = vsel %vm1143_vm5, %v2027_v37, %v2210_v22  ;;  %v4453_v55 = vpop.permute.xlu2 %1877  ;;  %v1735_v37 = vld [vmem:[#allocation7 + $0xb0] sm:$0xff]  ;;  %2966 = vmatmul.msk.f32.gmra.mxu2 %vm705_vm1, %v700_v4 }
 0x3a0   : > { %v1923_v60 = vmul.f32 %v1838_v58, %v1731_v50  ;;  %v1828_v56 = vpop.permute.xlu0 %1827  ;;  %v2647_v43 = vperm.slane %v1838_v58, %v3928_v52  ;;  %v2212_v47 = vsel %vm1145_vm6, %v2034_v23, %v2211_v5  ;;  %v1931_v36 = vmul.f32 %v4453_v55, %v1739_v57  ;;  %v2340_v5 = vpop.f32.mrf.mxu3 }
 0x3a1   : > { %v2046_v1 = vadd.f32 %v2045_v27, %v2044_v30  ;;  %v1921_v49 = vmul.f32 %v1828_v56, %v1729_v0  ;;  %v2645_v59 = vperm.slane %v1828_v56, %v3928_v52  ;;  %v2213_v24 = vsel %vm1147_vm7, %v2041_v41, %v2212_v47 }
 0x3a2   : > { %v2063_v39 = vsel %vm705_vm1, %v1923_v60, 0.0  ;;  %v2081_v30 = vadd.f32 %v2080_v7, %v2079_v46  ;;  %v2649_v0 = vperm.slane %v4412_v13, %v3928_v52  ;;  %v2101_v58 = vrot.slane %v2100_v8, 2  ;;  %v1737_v7 = vld [vmem:[#allocation7 + $0xc0] sm:$0xff] }
 0x3a3   : > { %v2064_v25 = vrot.slane %v2063_v39, 4  ;;  %v2049_v3 = vsel %vm705_vm1, %v1921_v49, 0.0  ;;  %v2047_v28 = vrot.slane %v2046_v1, 1  ;;  %v2675_v45 = vsel %vm1137_vm2, %v2646_v31, %v2645_v59  ;;  %v1742_v49 = vld [vmem:[#allocation7 + $0xe8] sm:$0xff] }
 0x3a4   : > { %v2050_v44 = vrot.slane %v2049_v3, 4  ;;  %v2676_v9 = vsel %vm1139_vm3, %v2647_v43, %v2675_v45  ;;  %v2062_v60 = vadd.f32 %v2061_v2, %v2060_v6  ;;  %v2119_v12 = vsel %vm705_vm1, %v1931_v36, 0.0  ;;  %v1738_v45 = vld [vmem:[#allocation7 + $0xc8] sm:$0xff] }
 0x3a5   : > { %v2065_v51 = vadd.f32 %v2064_v25, %v2063_v39  ;;  %v2048_v63 = vadd.f32 %v2047_v28, %v2046_v1  ;;  %v2082_v62 = vrot.slane %v2081_v30, 1  ;;  %v2652_v1 = vperm.slane %v4438_v14, %v3928_v52  ;;  %v4481_v14 = vld [vmem:[%s4748_s30] ss:$0 sm:$0xff]  ;;  %s3554_s30 = smov 128  }
 0x3a6   : > { %v2051_v42 = vadd.f32 %v2050_v44, %v2049_v3  ;;  %v2102_v38 = vadd.f32 %v2101_v58, %v2100_v8  ;;  %v2120_v44 = vrot.slane %v2119_v12, 4 }
 0x3a7   : > { %v2066_v53 = vrot.slane %v2065_v51, 2  ;;  %v1853_v19 = vpop.permute.xlu1 %1852  ;;  %v2214_v16 = vsel %vm1149_vm8, %v2048_v63, %v2213_v24  ;;  %v4474_v46 = vpop.permute.xlu2 %1892 }
 0x3a8   : > { %v2052_v26 = vrot.slane %v2051_v42, 2  ;;  %v1926_v48 = vmul.f32 %v1853_v19, %v1734_v32  ;;  %v1843_v10 = vpop.permute.xlu0 %1842  ;;  %2960 = vmatmul.msk.f32.gmra.mxu1 %vm705_vm1, %v2214_v16  ;;  %v2650_v13 = vperm.slane %v1853_v19, %v3928_v52  ;;  %v1934_v61 = vmul.f32 %v4474_v46, %v1742_v49 }
 0x3a9   : > { %v1924_v35 = vmul.f32 %v1843_v10, %v1732_v33  ;;  %v2648_v20 = vperm.slane %v1843_v10, %v3928_v52  ;;  %v2067_v29 = vadd.f32 %v2066_v53, %v2065_v51  ;;  %v4490_v53 = vadd.f32 %v4481_v14, %v2340_v5 }
 0x3aa   : > { %v2053_v34 = vadd.f32 %v2052_v26, %v2051_v42  ;;  %v2084_v18 = vsel %vm705_vm1, %v1926_v48, 0.0  ;;  %v2083_v48 = vadd.f32 %v2082_v62, %v2081_v30  ;;  %v2121_v10 = vadd.f32 %v2120_v44, %v2119_v12 }
 0x3ab   : > { %v2085_v17 = vrot.slane %v2084_v18, 4  ;;  %v2070_v50 = vsel %vm705_vm1, %v1924_v35, 0.0  ;;  %v2677_v54 = vsel %vm1141_vm4, %v2648_v20, %v2676_v9  ;;  %v2068_v56 = vrot.slane %v2067_v29, 1  ;;  %2436 = vrot.lane.b32.xlu2 %v4490_v53, %s3550_s26 }
 0x3ac   : > { %v2054_v40 = vrot.slane %v2053_v34, 1  ;;  %v2071_v21 = vrot.slane %v2070_v50, 4  ;;  %v2678_v15 = vsel %vm1143_vm5, %v2649_v0, %v2677_v54  ;;  %v2103_v2 = vrot.slane %v2102_v38, 1  ;;  %v2343_v54 = vpop.f32.mrf.mxu3 }
 0x3ad   : > { %v2086_v27 = vadd.f32 %v2085_v17, %v2084_v18  ;;  %v2679_v28 = vsel %vm1145_vm6, %v2650_v13, %v2678_v15  ;;  %v2069_v6 = vadd.f32 %v2068_v56, %v2067_v29  ;;  %v2140_v8 = vsel %vm705_vm1, %v1934_v61, 0.0 }
 0x3ae   : > { %v2072_v11 = vadd.f32 %v2071_v21, %v2070_v50  ;;  %v2055_v23 = vadd.f32 %v2054_v40, %v2053_v34  ;;  %v2122_v16 = vrot.slane %v2121_v10, 2  ;;  %v2141_v0 = vrot.slane %v2140_v8, 4 }
 0x3af   : > { %v2087_v25 = vrot.slane %v2086_v27, 2  ;;  %v2655_v12 = vperm.slane %v4453_v55, %v3928_v52  ;;  %v2104_v62 = vadd.f32 %v2103_v2, %v2102_v38 }
 0x3b0   : > { %v1858_v39 = vpop.permute.xlu0 %1857  ;;  %v2073_v59 = vrot.slane %v2072_v11, 2  ;;  %v2215_v43 = vsel %vm1137_vm2, %v2062_v60, %v2055_v23  ;;  %v1740_v60 = vld [vmem:[#allocation7 + $0xd8] sm:$0xff] }
 0x3b1   : > { %v1927_v3 = vmul.f32 %v1858_v39, %v1735_v37  ;;  %v2651_v22 = vperm.slane %v1858_v39, %v3928_v52  ;;  %v2088_v57 = vadd.f32 %v2087_v25, %v2086_v27  ;;  %v2216_v34 = vsel %vm1139_vm3, %v2069_v6, %v2215_v43  ;;  %v1741_v39 = vld [vmem:[#allocation7 + $0xe0] sm:$0xff] }
 0x3b2   : > { %v2074_v31 = vadd.f32 %v2073_v59, %v2072_v11  ;;  %v4505_v27 = vadd.f32 %v4481_v14, %v2343_v54  ;;  %v2123_v25 = vadd.f32 %v2122_v16, %v2121_v10  ;;  %v2142_v59 = vadd.f32 %v2141_v0, %v2140_v8 }
 0x3b3   : > { %v2091_v51 = vsel %vm705_vm1, %v1927_v3, 0.0  ;;  %v2680_v32 = vsel %vm1147_vm7, %v2651_v22, %v2679_v28  ;;  %v2089_v18 = vrot.slane %v2088_v57, 1  ;;  %v2658_v10 = vperm.slane %v4474_v46, %v3928_v52 }
 0x3b4   : > { %v2092_v42 = vrot.slane %v2091_v51, 4  ;;  %v2681_v33 = vsel %vm1149_vm8, %v2652_v1, %v2680_v32  ;;  %v2075_v19 = vrot.slane %v2074_v31, 1  ;;  %2438 = vrot.lane.b32.xlu1 %v4505_v27, %s3550_s26  ;;  %v2124_v2 = vrot.slane %v2123_v25, 1 }
 0x3b5   : > { %2695 = vst.msk [vmem:[%s3790_s20 + $0x10] sm:$0xff] %vm1176_vm9, %v2681_v33  ;;  %v2090_v15 = vadd.f32 %v2089_v18, %v2088_v57  ;;  %v2143_v8 = vrot.slane %v2142_v59, 2 }
 0x3b6   : > { %v2093_v47 = vadd.f32 %v2092_v42, %v2091_v51  ;;  %v1868_v26 = vpop.permute.xlu1 %1867  ;;  %v2076_v35 = vadd.f32 %v2075_v19, %v2074_v31 }
 0x3b7   : > { %v1929_v63 = vmul.f32 %v1868_v26, %v1737_v7  ;;  %v2653_v29 = vperm.slane %v1868_v26, %v3928_v52  ;;  %v2346_v7 = vpop.f32.mrf.mxu3 }
 0x3b8   : > { %v2094_v41 = vrot.slane %v2093_v47, 2  ;;  %v1873_v36 = vpop.permute.xlu0 %1872  ;;  %v2217_v50 = vsel %vm1141_vm4, %v2076_v35, %v2216_v34  ;;  %v4524_v19 = vadd.f32 %v4481_v14, %v2346_v7  ;;  %v1744_v34 = vld [vmem:[#allocation7 + $0xf8] sm:$0xff]  ;;  %v4556_v7 = vld [vmem:[%s4749_s2] ss:$0 sm:$0xff] }
 0x3b9   : > { %v2105_v20 = vsel %vm705_vm1, %v1929_v63, 0.0  ;;  %v1930_v17 = vmul.f32 %v1873_v36, %v1738_v45  ;;  %v2654_v30 = vperm.slane %v1873_v36, %v3928_v52  ;;  %v2218_v56 = vsel %vm1143_vm5, %v2083_v48, %v2217_v50  ;;  %v1743_v48 = vld [vmem:[#allocation7 + $0xf0] sm:$0xff] }
 0x3ba   : > { %v2095_v9 = vadd.f32 %v2094_v41, %v2093_v47  ;;  %v2106_v24 = vrot.slane %v2105_v20, 4  ;;  %v2219_v44 = vsel %vm1145_vm6, %v2090_v15, %v2218_v56  ;;  %2440 = vrot.lane.b32.xlu0 %v4524_v19, %s3550_s26 }
 0x3bb   : > { %v2112_v40 = vsel %vm705_vm1, %v1930_v17, 0.0  ;;  %v2682_v49 = vsel %vm1137_vm2, %v2654_v30, %v2653_v29 }
 0x3bc   : > { %v2096_v58 = vrot.slane %v2095_v9, 1  ;;  %v2107_v21 = vadd.f32 %v2106_v24, %v2105_v20  ;;  %v2113_v37 = vrot.slane %v2112_v40, 4  ;;  %v2683_v6 = vsel %vm1139_vm3, %v2655_v12, %v2682_v49 }
 0x3be   : > { %v2108_v1 = vrot.slane %v2107_v21, 2  ;;  %v2114_v13 = vadd.f32 %v2113_v37, %v2112_v40  ;;  %v1883_v11 = vpop.permute.xlu1 %1882  ;;  %v2097_v23 = vadd.f32 %v2096_v58, %v2095_v9  ;;  %v2125_v40 = vadd.f32 %v2124_v2, %v2123_v25 }
 0x3bf   : > { %v1932_v3 = vmul.f32 %v1883_v11, %v1740_v60  ;;  %v2656_v22 = vperm.slane %v1883_v11, %v3928_v52  ;;  %v2144_v60 = vadd.f32 %v2143_v8, %v2142_v59 }
 0x3c0   : > { %v2109_v55 = vadd.f32 %v2108_v1, %v2107_v21  ;;  %v2115_v28 = vrot.slane %v2114_v13, 2  ;;  %v1888_v38 = vpop.permute.xlu0 %1887  ;;  %v2220_v5 = vsel %vm1147_vm7, %v2097_v23, %v2219_v44 }
 0x3c1   : > { %v2126_v4 = vsel %vm705_vm1, %v1932_v3, 0.0  ;;  %v1933_v61 = vmul.f32 %v1888_v38, %v1741_v39  ;;  %v2657_v51 = vperm.slane %v1888_v38, %v3928_v52  ;;  %v2684_v42 = vsel %vm1141_vm4, %v2656_v22, %v2683_v6 }
 0x3c2   : > { %v2116_v32 = vadd.f32 %v2115_v28, %v2114_v13  ;;  %v2127_v31 = vrot.slane %v2126_v4, 4  ;;  %v2221_v33 = vsel %vm1149_vm8, %v2104_v62, %v2220_v5  ;;  %v2110_v43 = vrot.slane %v2109_v55, 1 }
 0x3c3   : > { %v2133_v57 = vsel %vm705_vm1, %v1933_v61, 0.0  ;;  %2961 = vmatmul.msk.f32.gmra.mxu1 %vm705_vm1, %v2221_v33  ;;  %v2685_v63 = vsel %vm1143_vm5, %v2657_v51, %v2684_v42  ;;  %v2145_v25 = vrot.slane %v2144_v60, 1 }
 0x3c4   : > { %v2117_v47 = vrot.slane %v2116_v32, 1  ;;  %v2128_v26 = vadd.f32 %v2127_v31, %v2126_v4  ;;  %v2134_v45 = vrot.slane %v2133_v57, 4  ;;  %v2111_v18 = vadd.f32 %v2110_v43, %v2109_v55  ;;  %v2349_v31 = vpop.f32.mrf.mxu3 }
 0x3c5   : > { %v2686_v46 = vsel %vm1145_vm6, %v2658_v10, %v2685_v63  ;;  %v2146_v38 = vadd.f32 %v2145_v25, %v2144_v60  ;;  %v4549_v42 = vadd.f32 %v4481_v14, %v2349_v31 }
 0x3c6   : > { %v2129_v35 = vrot.slane %v2128_v26, 2  ;;  %v2135_v41 = vadd.f32 %v2134_v45, %v2133_v57  ;;  %v1898_v36 = vpop.permute.xlu1 %1897  ;;  %v2118_v20 = vadd.f32 %v2117_v47, %v2116_v32 }
 0x3c7   : > { %v1935_v29 = vmul.f32 %v1898_v36, %v1743_v48  ;;  %v2659_v17 = vperm.slane %v1898_v36, %v3928_v52  ;;  %2442 = vrot.lane.b32.xlu2 %v4549_v42, %s3550_s26 }
 0x3c8   : > { %v2130_v9 = vadd.f32 %v2129_v35, %v2128_v26  ;;  %v2136_v24 = vrot.slane %v2135_v41, 2  ;;  %v1903_v30 = vpop.permute.xlu0 %1902  ;;  %v2222_v56 = vsel %vm1137_vm2, %v2118_v20, %v2111_v18 }
 0x3c9   : > { %v2147_v50 = vsel %vm705_vm1, %v1935_v29, 0.0  ;;  %v2687_v54 = vsel %vm1147_vm7, %v2659_v17, %v2686_v46  ;;  %v1936_v16 = vmul.f32 %v1903_v30, %v1744_v34  ;;  %v2660_v0 = vperm.slane %v1903_v30, %v3928_v52 }
 0x3ca   : > { %v2131_v58 = vrot.slane %v2130_v9, 1  ;;  %v2137_v21 = vadd.f32 %v2136_v24, %v2135_v41  ;;  %v2148_v37 = vrot.slane %v2147_v50, 4  ;;  %v2223_v23 = vsel %vm1139_vm3, %v2125_v40, %v2222_v56 }
 0x3cb   : > { %v2154_v12 = vsel %vm705_vm1, %v1936_v16, 0.0  ;;  %v2688_v15 = vsel %vm1149_vm8, %v2660_v0, %v2687_v54 }
 0x3cc   : > { %v2132_v62 = vadd.f32 %v2131_v58, %v2130_v9  ;;  %v2138_v1 = vrot.slane %v2137_v21, 1  ;;  %v2149_v13 = vadd.f32 %v2148_v37, %v2147_v50  ;;  %v2155_v49 = vrot.slane %v2154_v12, 4  ;;  %2696 = vst.msk [vmem:[%s3790_s20 + $0x18] sm:$0xff] %vm1176_vm9, %v2688_v15 }
 0x3ce   : > { %v2139_v11 = vadd.f32 %v2138_v1, %v2137_v21  ;;  %v2150_v39 = vrot.slane %v2149_v13, 2  ;;  %v2156_v52 = vadd.f32 %v2155_v49, %v2154_v12  ;;  %v2224_v3 = vsel %vm1141_vm4, %v2132_v62, %v2223_v23  ;;  %v2295_v33 = vpop.f32.mrf.mxu2 }
 0x3d0   : > { %v2151_v22 = vadd.f32 %v2150_v39, %v2149_v13  ;;  %v2157_v44 = vrot.slane %v2156_v52, 2  ;;  %v2225_v28 = vsel %vm1143_vm5, %v2139_v11, %v2224_v3 }
 0x3d1   : > { %v2226_v6 = vsel %vm1145_vm6, %v2146_v38, %v2225_v28 }
 0x3d2   : > { %v2152_v59 = vrot.slane %v2151_v22, 1  ;;  %v2158_v55 = vadd.f32 %v2157_v44, %v2156_v52 }
 0x3d4   : > { %v2153_v5 = vadd.f32 %v2152_v59, %v2151_v22  ;;  %v2159_v4 = vrot.slane %v2158_v55, 1 }
 0x3d6   : > { %v2160_v61 = vadd.f32 %v2159_v4, %v2158_v55  ;;  %v2227_v51 = vsel %vm1147_vm7, %v2153_v5, %v2226_v6 }
 0x3d8   : > { %v2228_v32 = vsel %vm1149_vm8, %v2160_v61, %v2227_v51 }
 0x3d9   : > { %2962 = vmatmul.msk.f32.gmra.mxu1 %vm705_vm1, %v2228_v32 }
 0x3ff   : > { %v2298_v10 = vpop.f32.mrf.mxu2 }
 0x405   : > { %v2437_v9 = vpop.permute.xlu2 %2436 }
 0x40f   : > { %v2254_v43 = vpop.f32.mrf.mxu1 }
 0x410   : > { %v2296_v57 = vadd.f32 %v2295_v33, %v2254_v43 }
 0x412   : > { %v4559_v47 = vadd.f32 %v4556_v7, %v2296_v57 }
 0x413   : > { %v2301_v16 = vpop.f32.mrf.mxu2 }
 0x414   : > { %v2352_v26 = vadd.f32 %v4490_v53, %v4559_v47 }
 0x416   : > { %v2971_v45 = vmul.f32 -1.442695, %v2352_v26 }
 0x418   : > { %3252 = vpow2.f32 %v2971_v45  ;;  %v3296_v45 = vld [vmem:[#allocation2] sm:$0xff] }
 0x41e   : > { %v3253_v14 = vpop.eup %3252 }
 0x41f   : > { %v2368_v48 = vadd.f32 1.0, %v3253_v14 }
 0x421   : > { %3254 = vrcp.f32 %v2368_v48  ;;  %v2383_v20 = vand.u32 2147483648, %v2368_v48  ;;  %v2381_v29 = vand.u32 2147483647, %v2368_v48  ;;  %vm2377_vm3 = vweird.f32 %v2368_v48 }
 0x422   : > { %v2304_v3 = vpop.f32.mrf.mxu2 }
 0x423   : > { %v2384_v24 = vor.u32 1.1754944e-38, %v2383_v20  ;;  %vm2382_vm5 = vcmp.eq.f32.partialorder %v2381_v29, 8.507059e+37 }
 0x425   : > { %v2257_v63 = vpop.f32.mrf.mxu1 }
 0x426   : > { %v2299_v2 = vadd.f32 %v2298_v10, %v2257_v63  ;;  %v2439_v49 = vpop.permute.xlu1 %2438 }
 0x427   : > { %v3255_v8 = vpop.eup %3254 }
 0x428   : > { %v4564_v35 = vadd.f32 %v4556_v7, %v2299_v2  ;;  %v2373_v41 = vmul.f32 %v3255_v8, %v2368_v48  ;;  %vm2378_vm2 = vweird.f32 %v3255_v8 }
 0x429   : > { %vm2379_vm4 = vmor %vm2377_vm3, %vm2378_vm2 }
 0x42a   : > { %v2353_v36 = vadd.f32 %v4505_v27, %v4564_v35  ;;  %v2374_v34 = vsub.f32 1.0, %v2373_v41 }
 0x42c   : > { %v2972_v18 = vmul.f32 -1.442695, %v2353_v36  ;;  %v2375_v53 = vmul.f32 %v3255_v8, %v2374_v34  ;;  %v2441_v33 = vpop.permute.xlu0 %2440  ;;  %v2443_v36 = vpop.permute.xlu2 %2442 }
 0x42e   : > { %3256 = vpow2.f32 %v2972_v18  ;;  %v2376_v17 = vadd.f32 %v3255_v8, %v2375_v53 }
 0x430   : > { %v2380_v46 = vsel %vm2379_vm4, %v3255_v8, %v2376_v17 }
 0x431   : > { %v4568_v30 = vsel %vm2382_vm5, %v2384_v24, %v2380_v46  ;;  %v3297_v24 = vld [vmem:[#allocation2 + $0x8] sm:$0xff] }
 0x432   : > { %v2448_v50 = vmul.f32 %v2437_v9, %v4568_v30 }
 0x434   : > { %v3257_v54 = vpop.eup %3256  ;;  %2456 = vrot.lane.b32.xlu1 %v2448_v50, %s3550_s26 }
 0x435   : > { %v2369_v27 = vadd.f32 1.0, %v3257_v54 }
 0x437   : > { %3258 = vrcp.f32 %v2369_v27  ;;  %v2398_v12 = vand.u32 2147483648, %v2369_v27  ;;  %v2396_v1 = vand.u32 2147483647, %v2369_v27  ;;  %vm2392_vm7 = vweird.f32 %v2369_v27 }
 0x439   : > { %v2399_v11 = vor.u32 1.1754944e-38, %v2398_v12  ;;  %vm2397_vm9 = vcmp.eq.f32.partialorder %v2396_v1, 8.507059e+37 }
 0x43d   : > { %v3259_v58 = vpop.eup %3258 }
 0x43e   : > { %v2388_v37 = vmul.f32 %v3259_v58, %v2369_v27  ;;  %vm2393_vm6 = vweird.f32 %v3259_v58 }
 0x43f   : > { %vm2394_vm8 = vmor %vm2392_vm7, %vm2393_vm6 }
 0x440   : > { %v2260_v0 = vpop.f32.mrf.mxu1  ;;  %v2389_v56 = vsub.f32 1.0, %v2388_v37 }
 0x441   : > { %v2302_v40 = vadd.f32 %v2301_v16, %v2260_v0  ;;  %v3298_v0 = vld [vmem:[#allocation2 + $0x18] sm:$0xff] }
 0x442   : > { %v2390_v62 = vmul.f32 %v3259_v58, %v2389_v56 }
 0x443   : > { %v4573_v21 = vadd.f32 %v4556_v7, %v2302_v40  ;;  %v3299_v40 = vld [vmem:[#allocation2 + $0x10] sm:$0xff] }
 0x444   : > { %v2391_v13 = vadd.f32 %v3259_v58, %v2390_v62 }
 0x445   : > { %v2354_v60 = vadd.f32 %v4524_v19, %v4573_v21 }
 0x446   : > { %v2395_v39 = vsel %vm2394_vm8, %v3259_v58, %v2391_v13 }
 0x447   : > { %v2973_v15 = vmul.f32 -1.442695, %v2354_v60  ;;  %v4577_v52 = vsel %vm2397_vm9, %v2399_v11, %v2395_v39  ;;  %v2476_v60 = vsub.f32 1.0, %v4568_v30 }
 0x448   : > { %v2449_v23 = vmul.f32 %v2439_v49, %v4577_v52  ;;  %v2477_v13 = vsub.f32 1.0, %v4577_v52 }
 0x449   : > { %3260 = vpow2.f32 %v2973_v15 }
 0x44a   : > { %2458 = vrot.lane.b32.xlu0 %v2449_v23, %s3550_s26 }
 0x44f   : > { %v3261_v25 = vpop.eup %3260 }
 0x450   : > { %v2370_v19 = vadd.f32 1.0, %v3261_v25 }
 0x452   : > { %3262 = vrcp.f32 %v2370_v19  ;;  %v2413_v4 = vand.u32 2147483648, %v2370_v19  ;;  %v2411_v51 = vand.u32 2147483647, %v2370_v19  ;;  %vm2407_vm13 = vweird.f32 %v2370_v19 }
 0x454   : > { %v2414_v31 = vor.u32 1.1754944e-38, %v2413_v4  ;;  %vm2412_vm15 = vcmp.eq.f32.partialorder %v2411_v51, 8.507059e+37 }
 0x456   : > { %v2263_v22 = vpop.f32.mrf.mxu1 }
 0x457   : > { %v2305_v44 = vadd.f32 %v2304_v3, %v2263_v22 }
 0x458   : > { %v3263_v59 = vpop.eup %3262 }
 0x459   : > { %v4582_v55 = vadd.f32 %v4556_v7, %v2305_v44  ;;  %v2403_v28 = vmul.f32 %v3263_v59, %v2370_v19  ;;  %vm2408_vm12 = vweird.f32 %v3263_v59 }
 0x45a   : > { %vm2409_vm14 = vmor %vm2407_vm13, %vm2408_vm12 }
 0x45b   : > { %v2355_v38 = vadd.f32 %v4549_v42, %v4582_v55  ;;  %v2404_v5 = vsub.f32 1.0, %v2403_v28  ;;  %v2521_v28 = vld [vmem:[#allocation10 + $0x8] sm:$0xff] }
 0x45d   : > { %v2974_v6 = vmul.f32 -1.442695, %v2355_v38  ;;  %v2405_v61 = vmul.f32 %v3263_v59, %v2404_v5 }
 0x45f   : > { %3264 = vpow2.f32 %v2974_v6  ;;  %v2406_v32 = vadd.f32 %v3263_v59, %v2405_v61 }
 0x461   : > { %v2410_v43 = vsel %vm2409_vm14, %v3263_v59, %v2406_v32  ;;  %v2523_v59 = vld [vmem:[#allocation10 + $0x18] sm:$0xff] }
 0x462   : > { %v4586_v7 = vsel %vm2412_vm15, %v2414_v31, %v2410_v43  ;;  %2560 = vmatpush.msrb.mxu0 %v2523_v59 }
 0x463   : > { %v2450_v57 = vmul.f32 %v2441_v33, %v4586_v7  ;;  %v2478_v19 = vsub.f32 1.0, %v4586_v7 }
 0x465   : > { %v3265_v26 = vpop.eup %3264  ;;  %2460 = vrot.lane.b32.xlu2 %v2450_v57, %s3550_s26 }
 0x466   : > { %v2371_v42 = vadd.f32 1.0, %v3265_v26 }
 0x468   : > { %3266 = vrcp.f32 %v2371_v42  ;;  %v2428_v63 = vand.u32 2147483648, %v2371_v42  ;;  %v2426_v8 = vand.u32 2147483647, %v2371_v42  ;;  %vm2422_vm10 = vweird.f32 %v2371_v42 }
 0x46a   : > { %v2429_v34 = vor.u32 1.1754944e-38, %v2428_v63  ;;  %vm2427_vm2 = vcmp.eq.f32.partialorder %v2426_v8, 8.507059e+37 }
 0x46d   : > { %2500 = vrot.lane.b32.xlu2 %v3296_v45, %s3551_s28 }
 0x46e   : > { %v3267_v14 = vpop.eup %3266 }
 0x46f   : > { %v2418_v48 = vmul.f32 %v3267_v14, %v2371_v42  ;;  %vm2423_vm0 = vweird.f32 %v3267_v14 }
 0x470   : > { %vm2424_vm11 = vmor %vm2422_vm10, %vm2423_vm0 }
 0x471   : > { %v2419_v10 = vsub.f32 1.0, %v2418_v48 }
 0x473   : > { %v2420_v2 = vmul.f32 %v3267_v14, %v2419_v10 }
 0x475   : > { %v2421_v41 = vadd.f32 %v3267_v14, %v2420_v2 }
 0x477   : > { %v2425_v18 = vsel %vm2424_vm11, %v3267_v14, %v2421_v41 }
 0x478   : > { %v4591_v20 = vsel %vm2427_vm2, %v2429_v34, %v2425_v18 }
 0x479   : > { %v2451_v53 = vmul.f32 %v2443_v36, %v4591_v20  ;;  %v2479_v5 = vsub.f32 1.0, %v4591_v20 }
 0x47b   : > { %2462 = vrot.lane.b32.xlu1 %v2451_v53, %s3550_s26  ;;  %s3555_s26 = smov 8  }
 0x4a6   : > { %v2457_v29 = vpop.permute.xlu1 %2456 }
 0x4a7   : > { %v2468_v17 = vadd.f32 %v2457_v29, %v4559_v47 }
 0x4a9   : > { %3268 = vtanh.f32 %v2468_v17 }
 0x4af   : > { %v3269_v9 = vpop.eup %3268 }
 0x4b0   : > { %2484 = vrot.lane.b32.xlu0 %v3269_v9, %s3552_s21 }
 0x4b8   : > { %2502 = vrot.lane.b32.xlu0 %v3297_v24, %s3551_s28 }
 0x4bc   : > { %v2459_v54 = vpop.permute.xlu0 %2458 }
 0x4bd   : > { %v2469_v27 = vadd.f32 %v2459_v54, %v4564_v35 }
 0x4bf   : > { %v2461_v46 = vpop.permute.xlu2 %2460 }
 0x4c0   : > { %v2470_v50 = vadd.f32 %v2461_v46, %v4573_v21 }
 0x4c2   : > { %3270 = vtanh.f32 %v2470_v50 }
 0x4c3   : > { %3272 = vtanh.f32 %v2469_v27 }
 0x4c7   : > { %v2501_v35 = vpop.permute.xlu2 %2500 }
 0x4c8   : > { %v3271_v16 = vpop.eup %3270  ;;  %v2512_v12 = vmul.f32 %v2501_v35, %v4568_v30 }
 0x4c9   : > { %2488 = vrot.lane.b32.xlu2 %v3271_v16, %s3552_s21  ;;  %v3273_v47 = vpop.eup %3272 }
 0x4ca   : > { %2486 = vrot.lane.b32.xlu1 %v3273_v47, %s3552_s21 }
 0x4d1   : > { %2506 = vrot.lane.b32.xlu2 %v3298_v0, %s3551_s28 }
 0x4d2   : > { %2504 = vrot.lane.b32.xlu1 %v3299_v40, %s3551_s28 }
 0x4ed   : > { %v2463_v58 = vpop.permute.xlu1 %2462 }
 0x4ee   : > { %v2471_v21 = vadd.f32 %v2463_v58, %v4582_v55  ;;  %v2522_v55 = vld [vmem:[#allocation10 + $0x10] sm:$0xff] }
 0x4ef   : > { %2561 = vmatpush.msrb.mxu0 %v2522_v55 }
 0x4f0   : > { %3274 = vtanh.f32 %v2471_v21 }
 0x4f1   : > { %2562 = vmatpush.msrb.mxu0 %v2521_v28 }
 0x4f6   : > { %v3275_v37 = vpop.eup %3274 }
 0x4f7   : > { %2490 = vrot.lane.b32.xlu0 %v3275_v37, %s3552_s21 }
 0x522   : > { %v2485_v56 = vpop.permute.xlu0 %2484 }
 0x523   : > { %v2496_v15 = vmul.f32 %v2485_v56, %v2476_v60  ;;  %v2489_v25 = vpop.permute.xlu2 %2488 }
 0x524   : > { %v2498_v22 = vmul.f32 %v2489_v25, %v2478_v19 }
 0x525   : > { %v2516_v62 = vadd.f32 %v2512_v12, %v2496_v15 }
 0x527   : > { %2532 = vrot.lane.b32.xlu1 %v2516_v62, %s3552_s21 }
 0x52a   : > { %v2503_v1 = vpop.permute.xlu0 %2502 }
 0x52b   : > { %v2513_v11 = vmul.f32 %v2503_v1, %v4577_v52  ;;  %v2520_v52 = vld [vmem:[#allocation10] sm:$0xff]  ;;  %v2507_v38 = vpop.permute.xlu2 %2506 }
 0x52c   : > { %2563 = vmatpush.msrb.mxu0 %v2520_v52  ;;  %v2515_v6 = vmul.f32 %v2507_v38, %v4591_v20 }
 0x53c   : > { %v2487_v49 = vpop.permute.xlu1 %2486 }
 0x53d   : > { %v2497_v39 = vmul.f32 %v2487_v49, %v2477_v13 }
 0x53f   : > { %v2517_v23 = vadd.f32 %v2513_v11, %v2497_v39 }
 0x541   : > { %2534 = vrot.lane.b32.xlu0 %v2517_v23, %s3552_s21 }
 0x544   : > { %v2505_v3 = vpop.permute.xlu1 %2504 }
 0x545   : > { %v2514_v30 = vmul.f32 %v2505_v3, %v4586_v7  ;;  %v3115_v7 = vld [vmem:[%s4750_s17] ss:$0 sm:$0xff]  ;;  %s2725_s17 = sshll.u32 %s3792_s1, 4  ;;  %s2726_s17 = int_to_ptr.vmem [resolvable:$true] %s2725_s17 }
 0x547   : > { %v2518_v44 = vadd.f32 %v2514_v30, %v2498_v22 }
 0x549   : > { %2536 = vrot.lane.b32.xlu2 %v2518_v44, %s3552_s21 }
 0x569   : > { %v2491_v4 = vpop.permute.xlu0 %2490 }
 0x56a   : > { %v2499_v61 = vmul.f32 %v2491_v4, %v2479_v5 }
 0x56c   : > { %v2519_v51 = vadd.f32 %v2515_v6, %v2499_v61 }
 0x56e   : > { %2538 = vrot.lane.b32.xlu1 %v2519_v51, %s3552_s21  ;;  %s4754_s21 = sld [smem:[#allocation33_spill]] }
 0x574   : > { %s4755_s8 = smov %s4754_s21  ;;  %s2724_s12 = scalar_lea.hbm %s4754_s21, %s2988_s16 }
 0x575   : > { %s2727_s0 = sshll.u32 %s2724_s12, 4  ;;  %s2728_s0 = int_to_ptr.hbm [resolvable:$true] %s2727_s0 }
 0x576   : > { %s3462_s18 = sshra.s32 %s2728_s0, 4  ;;  %s3463_s18 = int_to_ptr.hbm [resolvable:$true] %s3462_s18 }
 0x577   : > { %s3464_s10 = scalar_lea.hbm %s3463_s18, 32  ;;  %p3469_p12 = scmp.lt.s32.totalorder %s3463_s18, %s4755_s8 }
 0x578   : > { %p3465_p1 = scmp.ne.s32.totalorder %s3463_s18, %s3464_s10 }
 0x57a   : > { %p3466_p10 = pnand %p3465_p1, %p3744_p3 }
 0x57c   : > { %p3467_p11 = pneg %p3466_p10 }
 0x599   : > { %v2533_v32 = vpop.permute.xlu1 %2532 }
 0x59a   : > { %2621 = vst.msk [vmem:[#allocation2] sm:$0xff] %vm705_vm1, %v2533_v32  ;;  %2975 = vmatmul.msk.f32.vlgmr.msrb.gmra.mxu0 %vm705_vm1, %v2533_v32 }
 0x59b   : > { %2697 = vst.msk [vmem:[#allocation13] sm:$0xff] %vm705_vm1, %v2533_v32 }
 0x5a3   : > { %v2537_v31 = vpop.permute.xlu2 %2536 }
 0x5a4   : > { %2623 = vst.msk [vmem:[#allocation2 + $0x10] sm:$0xff] %vm705_vm1, %v2537_v31 }
 0x5a5   : > { %2699 = vst.msk [vmem:[#allocation13 + $0x10] sm:$0xff] %vm705_vm1, %v2537_v31 }
 0x5b3   : > { %v2535_v33 = vpop.permute.xlu0 %2534 }
 0x5b4   : > { %2622 = vst.msk [vmem:[#allocation2 + $0x8] sm:$0xff] %vm705_vm1, %v2535_v33  ;;  %2976 = vmatmul.msk.f32.gmra.mxu0 %vm705_vm1, %v2535_v33 }
 0x5b5   : > { %2698 = vst.msk [vmem:[#allocation13 + $0x8] sm:$0xff] %vm705_vm1, %v2535_v33 }
 0x5bc   : > { %2977 = vmatmul.msk.f32.gmra.mxu0 %vm705_vm1, %v2537_v31 }
 0x5e0   : > { %v2539_v43 = vpop.permute.xlu1 %2538 }
 0x5e1   : > { %2624 = vst.msk [vmem:[#allocation2 + $0x18] sm:$0xff] %vm705_vm1, %v2539_v43  ;;  %2978 = vmatmul.msk.f32.gmra.mxu0 %vm705_vm1, %v2539_v43 }
 0x5e2   : > { %2700 = vst.msk [vmem:[#allocation13 + $0x18] sm:$0xff] %vm705_vm1, %v2539_v43 }
 0x5e3   : > { %3017 = dma.vmem_to_hbm [thread:$0]  (%p3679_p2), %s2747_s11, 512, %s2749_s29, [#allocation14], %s3554_s30, %s3554_s30, %s3555_s26  }
 0x5e4   : > { %s2702_s11 = scalar_lea.sflag [#allocation6], %s3767_s19  ;;  %s3468_s29 = scalar_lea.hbm %s4755_s8, 320 }
 0x5e5   : > { %p3470_p13 = scmp.lt.s32.totalorder %s3468_s29, %s3464_s10 }
 0x5e7   : > { %p3471_p0 = por %p3470_p13, %p3469_p12 }
 0x5e9   : > { %p3472_p5 = pnand %p3471_p0, %p3467_p11 }
 0x617   : > { %v2565_v57 = vpop.f32.mrf.mxu0 }
 0x618   : > { %v2566_v26 = vadd.f32 %v3115_v7, %v2565_v57 }
 0x61a   : > { %2577 = vmax.xlane.f32.xlu0 %v2566_v26 }
 0x631   : > { %v2568_v42 = vpop.f32.mrf.mxu0 }
 0x632   : > { %v2569_v45 = vadd.f32 %v3115_v7, %v2568_v42 }
 0x634   : > { %2579 = vmax.xlane.f32.xlu2 %v2569_v45 }
 0x639   : > { %v2571_v14 = vpop.f32.mrf.mxu0 }
 0x63a   : > { %v2572_v48 = vadd.f32 %v3115_v7, %v2571_v14 }
 0x63c   : > { %2581 = vmax.xlane.f32.xlu1 %v2572_v48 }
 0x65e   : > { %v2574_v10 = vpop.f32.mrf.mxu0 }
 0x65f   : > { %v2575_v63 = vadd.f32 %v3115_v7, %v2574_v10 }
 0x661   : > { %2583 = vmax.xlane.f32.xlu0 %v2575_v63 }
 0x68d   : > { %v2578_v2 = vpop.xlane.xlu0 %2577 }
 0x68e   : > { %v2585_v8 = vsub.f32 %v2566_v26, %v2578_v2 }
 0x690   : > { %v2589_v41 = vmul.f32 1.442695, %v2585_v8 }
 0x692   : > { %3276 = vpow2.f32 %v2589_v41 }
 0x698   : > { %v3277_v36 = vpop.eup %3276 }
 0x699   : > { %2597 = vadd.xlane.f32.xlu2 %v3277_v36 }
 0x6a7   : > { %v2580_v34 = vpop.xlane.xlu2 %2579 }
 0x6a8   : > { %v2586_v18 = vsub.f32 %v2569_v45, %v2580_v34 }
 0x6aa   : > { %v2591_v20 = vmul.f32 1.442695, %v2586_v18 }
 0x6ac   : > { %3278 = vpow2.f32 %v2591_v20 }
 0x6af   : > { %v2582_v53 = vpop.xlane.xlu1 %2581 }
 0x6b0   : > { %v2587_v29 = vsub.f32 %v2572_v48, %v2582_v53 }
 0x6b2   : > { %v3279_v17 = vpop.eup %3278  ;;  %v2593_v9 = vmul.f32 1.442695, %v2587_v29 }
 0x6b3   : > { %2599 = vadd.xlane.f32.xlu1 %v3279_v17 }
 0x6b4   : > { %3280 = vpow2.f32 %v2593_v9 }
 0x6ba   : > { %v3281_v24 = vpop.eup %3280 }
 0x6bb   : > { %2601 = vadd.xlane.f32.xlu0 %v3281_v24 }
 0x6d4   : > { %v2584_v46 = vpop.xlane.xlu0 %2583 }
 0x6d5   : > { %v2588_v50 = vsub.f32 %v2575_v63, %v2584_v46 }
 0x6d7   : > { %v2595_v54 = vmul.f32 1.442695, %v2588_v50 }
 0x6d9   : > { %3282 = vpow2.f32 %v2595_v54 }
 0x6df   : > { %v3283_v27 = vpop.eup %3282 }
 0x6e0   : > { %2603 = vadd.xlane.f32.xlu2 %v3283_v27 }
 0x70c   : > { %v2598_v16 = vpop.xlane.xlu2 %2597 }
 0x70d   : > { %3284 = vlog2.f32 %v2598_v16 }
 0x713   : > { %v3285_v47 = vpop.eup %3284 }
 0x714   : > { %v2606_v0 = vmul.f32 0.6931472, %v3285_v47 }
 0x716   : > { %v2613_v40 = vsub.f32 %v2585_v8, %v2606_v0 }
 0x718   : > { %2625 = vst [vmem:[%s3792_s1] sm:$0xff] %v2613_v40 }
 0x726   : > { %v2600_v58 = vpop.xlane.xlu1 %2599 }
 0x727   : > { %3286 = vlog2.f32 %v2600_v58 }
 0x72d   : > { %v3287_v21 = vpop.eup %3286 }
 0x72e   : > { %v2608_v37 = vmul.f32 0.6931472, %v3287_v21  ;;  %v2602_v35 = vpop.xlane.xlu0 %2601 }
 0x72f   : > { %3288 = vlog2.f32 %v2602_v35 }
 0x730   : > { %v2614_v60 = vsub.f32 %v2586_v18, %v2608_v37 }
 0x732   : > { %2626 = vst [vmem:[%s3792_s1 + $0x8] sm:$0xff] %v2614_v60 }
 0x735   : > { %v3289_v56 = vpop.eup %3288 }
 0x736   : > { %v2610_v12 = vmul.f32 0.6931472, %v3289_v56 }
 0x738   : > { %v2615_v15 = vsub.f32 %v2587_v29, %v2610_v12 }
 0x73a   : > { %2627 = vst [vmem:[%s3792_s1 + $0x10] sm:$0xff] %v2615_v15 }
 0x753   : > { %v2604_v62 = vpop.xlane.xlu2 %2603 }
 0x754   : > { %3290 = vlog2.f32 %v2604_v62 }
 0x75a   : > { %v3291_v1 = vpop.eup %3290 }
 0x75b   : > { %v2612_v13 = vmul.f32 0.6931472, %v3291_v1 }
 0x75d   : > { %v2616_v49 = vsub.f32 %v2588_v50, %v2612_v13 }
 0x75f   : > { %2628 = vst [vmem:[%s3792_s1 + $0x18] sm:$0xff] %v2616_v49 }
 0x760   : > { %3475 = shalt.err (!%p3472_p5)
}
 0x761   : > { %3015 = dma.vmem_to_hbm [thread:$0]  (%p3744_p3), %s2726_s17, 512, %s2728_s0, %s2702_s11, %s3554_s30, %s3554_s30, %s3555_s26  }
 0x762   : > { %3513 = dma.done.wait (%p3679_p2), [#allocation14], 512  }
 0x763   : > { %3515 = vsyncadd (%p3679_p2), [#allocation14], 4294966784 }
 0x764 PF: > { %s4756_s19 = sld [smem:[#allocation21_spill]] }
 0x765   : > { %s4757_s1 = sld [smem:[#allocation20_spill]] }
 0x76a   : > { %p3048_p7 = scmp.ge.s32.totalorder %s4756_s19, 2 }
 0x76b   : > { %s2768_s21 = sand.u32 1, %s4757_s1  }
 0x76c   : > { %p3036_p9 = pnand %p3048_p7, %p3690_p6  ;;  %s2769_s20 = scalar_lea.sflag [#allocation6], %s2768_s21 }
 0x76e   : > { %p3037_p8 = pneg %p3036_p9 }
 0x770   : > { %3517 = dma.done.wait (%p3037_p8), %s2769_s20, 512  }
 0x771   : > { %3519 = vsyncadd (%p3037_p8), %s2769_s20, 4294966784  ;;  %s36_s25 = sadd.s32 1, %s4756_s19   ;;  %s4759_s14 = sld [smem:[#allocation24_spill]] }
 0x772   : > { %p33_p3 = scmp.ge.s32.totalorder %s36_s25, 12   ;;  %s4760_s21 = smov %s3526_s22 }
 0x773   : > { %s4761_s22 = smov %s3530_s13  ;;  %s4762_s13 = smov %s3753_s27 }
 0x774   : > { %s4763_s23 = smov %s3538_s24  ;;  %35 = sbr.rel (!%p33_p3) target bundleno = 19 (0x13), region = 163 }
 0x777   : > { %s4764_s24 = smov %s4759_s14 }
 0x779   :  { %2787 = vsyncpa [#allocation5], 1 }
 0x77a   :  { %2789 = vsyncpa [#allocation5 + $0x1], 1 }
 0x77b   :  { %2790 = vsyncpa [#allocation8], 1 }
 0x77c   :  { %2791 = vsyncpa [#allocation11], 1 }
 0x77d   :  { %2792 = vsyncpa [#allocation6], 1 }
 0x77e   :  { %2794 = vsyncpa [#allocation6 + $0x1], 1 }
 0x77f   :  { %2795 = vsyncpa [#allocation14], 1 }

</bundles_post_ra>
